<compile_context>
chip_gen: v6e
topology: v6e:2x2x1
jax: 0.10.0
libtpu: 0.0.40
codegen_flags: <defaults>
</compile_context>

<pallas_src>
import jax
import jax.numpy as jnp
from jax.experimental import pallas as pl
from jax.experimental.pallas import tpu as pltpu


# ------------------------------ static layouts --------------------------------

def _round_up(x, m):
    return ((x + m - 1) // m) * m


def _vec_layout(audio_size, text_size, hidden, num_classes):
    """Row layout of the packed (rows, lanes) f32 vector slab (biases, LN
    params, 1-row weights) -- one entry per sublane, lane-padded."""
    h, h2, c = hidden, hidden // 2, num_classes
    order = [
        ("ln_a_g", audio_size), ("ln_a_b", audio_size),
        ("ba", h), ("bd1", h), ("bd2", h),
        ("bm1", h2), ("wm2_row", h2), ("bm2", 1),
        ("ln_t_g", text_size), ("ln_t_b", text_size), ("bt", h),
        ("bac1", h2), ("wac2_row", h2), ("bac2", 1),
        ("btc1", h2), ("wtc2_row", h2), ("btc2", 1),
        ("bacl", c), ("btcl", c), ("bfcl", c),
        ("wg1_ac", h), ("wg1_tc", h), ("bg1", h),
        ("bg2", 3),
    ]
    idx = {name: (row, width) for row, (name, width) in enumerate(order)}
    rows = _round_up(len(order), 8)
    width = _round_up(max(w for _, w in order), 128)
    return idx, rows, width


def _w32_layout(hidden, num_classes):
    """Column layout of the packed (hidden, cols) bf16 weight slab.

    Weights consumed by the same activation are adjacent (-> one fused MXU
    matmul per group), and every group is padded to a 128-lane boundary so the
    in-kernel slice of w32 is a clean, aligned view."""
    h, h2, c = hidden, hidden // 2, num_classes
    groups_def = [
        ("pre_mix",     [("wd1", h), ("wm1_a", h2)]),            # consumes a0
        ("denoise2",    [("wd2", h)]),                            # gelu(denoise L1)
        ("mix_d",       [("wm1_d", h2)]),                         # denoised audio
        ("audio_heads", [("wac1", h2), ("wacl", c),
                         ("wfcl_a", c), ("wg1_a", h)]),           # mixed audio
        ("text_heads",  [("wtc1", h2), ("wtcl", c),
                         ("wfcl_t", c), ("wg1_t", h)]),           # text features
        ("gate2",       [("wg2", 3)]),                            # gate hidden
    ]
    col_off, group_span = {}, {}
    pos = 0
    for gname, members in groups_def:
        start = pos
        for name, width in members:
            col_off[name] = (pos, width)
            pos += width
        padded = _round_up(pos - start, 128)
        group_span[gname] = (start, padded)
        pos = start + padded
    return col_off, group_span, pos


def _out_layout(hidden, num_classes):
    """Column layout of the single lane-dense output slab."""
    h, c = hidden, num_classes
    order = [
        ("audio_embed", h), ("text_embed", h), ("fusion_embed", 2 * h),
        ("logits", c), ("audio_logits", c), ("text_logits", c),
        ("fusion_logits", c),
        ("ensemble_weights", 3),
        ("audio_confidence", 1), ("text_confidence", 1),
        ("audio_noise_mix_ratio", 1), ("class_preds", 1),
    ]
    off, pos = {}, 0
    for name, width in order:
        off[name] = (pos, width)
        pos += width
    return off, pos, _round_up(pos, 128)


# --------------------------------- kernel ------------------------------------

def _make_kernel(audio_size, text_size, hidden, num_classes):
    h, h2, c = hidden, hidden // 2, num_classes
    vec_idx, _, _ = _vec_layout(audio_size, text_size, hidden, num_classes)
    _, group_span, _ = _w32_layout(hidden, num_classes)
    _, out_used, out_w = _out_layout(hidden, num_classes)

    def kernel(audio_ref, text_ref, wa_ref, wt_ref, w32_ref, vecs_ref, out_ref):
        def vec(name):                              # (1, width) bias / LN / row
            row, width = vec_idx[name]
            return vecs_ref[row:row + 1, :width]

        def wgrp(name):                             # 128-aligned weight group view
            s, w = group_span[name]
            return w32_ref[:, s:s + w]

        def gelu(x):
            # tanh-approx GELU (EUP path).  Accuracy-accepted deviation from
            # torch's exact-erf nn.GELU (max abs diff ~1e-3).
            c0 = 0.7978845608028654                 # sqrt(2/pi)
            return 0.5 * x * (1.0 + jnp.tanh(c0 * (x + 0.044715 * x * x * x)))

        def layernorm(x, g, b, eps=1e-5):
            mean = jnp.mean(x, axis=-1, keepdims=True)
            var = jnp.mean((x - mean) ** 2, axis=-1, keepdims=True)
            return (x - mean) * jax.lax.rsqrt(var + eps) * g + b

        def mm(x, w):                               # bf16 operands, f32 accumulate
            return jnp.dot(x.astype(w.dtype), w,
                           preferred_element_type=jnp.float32)

        def row_dot(x, w_row, b):                   # N=1 "matmul" on VPU + lane reduce
            return jnp.sum(x * w_row, axis=-1, keepdims=True) + b

        # ---- audio branch: LayerNorm -> Linear -> GELU (Dropout = identity) ----
        a0 = layernorm(audio_ref[...], vec("ln_a_g"), vec("ln_a_b"))
        a0 = gelu(mm(a0, wa_ref[...]) + vec("ba"))

        # ---- denoise L1 + mix-controller (audio part): one fused matmul ----
        p0 = mm(a0, wgrp("pre_mix"))                # [0:h]=wd1, [h:h+h2]=wm1_a
        d = mm(gelu(p0[:, :h] + vec("bd1")), wgrp("denoise2"))[:, :h] + vec("bd2")
        hm = jnp.maximum(
            p0[:, h:h + h2] + mm(d, wgrp("mix_d"))[:, :h2] + vec("bm1"), 0.0)
        mix = jax.nn.sigmoid(row_dot(hm, vec("wm2_row"), vec("bm2")))
        a = mix * d + (1.0 - mix) * a0              # adaptive residual mixing

        # ---- text branch: LayerNorm -> Linear -> GELU ----
        t = layernorm(text_ref[...], vec("ln_t_g"), vec("ln_t_b"))
        t = gelu(mm(t, wt_ref[...]) + vec("bt"))

        # ---- everything consuming mixed audio: one fused matmul ----
        pa = mm(a, wgrp("audio_heads"))
        ac = jax.nn.sigmoid(row_dot(
            jnp.maximum(pa[:, :h2] + vec("bac1"), 0.0),
            vec("wac2_row"), vec("bac2")))
        alog = pa[:, h2:h2 + c] + vec("bacl")
        aflog = pa[:, h2 + c:h2 + 2 * c]            # a @ Wfusion[:h]
        g_a = pa[:, h2 + 2 * c:h2 + 2 * c + h]      # a @ Wgate[:h]

        # ---- everything consuming text features: one fused matmul ----
        pt = mm(t, wgrp("text_heads"))
        tc = jax.nn.sigmoid(row_dot(
            jnp.maximum(pt[:, :h2] + vec("btc1"), 0.0),
            vec("wtc2_row"), vec("btc2")))
        tlog = pt[:, h2:h2 + c] + vec("btcl")
        tflog = pt[:, h2 + c:h2 + 2 * c]
        g_t = pt[:, h2 + 2 * c:h2 + 2 * c + h]

        af = a * ac
        tf = t * tc
        # cat([a*ac, t*tc]) @ Wfcl == ac*(a@Wfcl_a) + tc*(t@Wfcl_t): per-row scalars
        flog = ac * aflog + tc * tflog + vec("bfcl")

        # ---- adaptive gate on cat([a, t, ac, tc]) (decomposed, exact) ----
        g = jnp.maximum(
            g_a + g_t + ac * vec("wg1_ac") + tc * vec("wg1_tc") + vec("bg1"), 0.0)
        gl = mm(g, wgrp("gate2"))[:, :3] + vec("bg2")
        gl = gl - jnp.max(gl, axis=-1, keepdims=True)
        ge = jnp.exp(gl)
        ens = ge / jnp.sum(ge, axis=-1, keepdims=True)      # softmax(dim=-1), f32

        final = ens[:, 0:1] * alog + ens[:, 1:2] * tlog + ens[:, 2:3] * flog

        # argmax over classes (first max index), carried as f32 in the slab
        mx = jnp.max(final, axis=-1, keepdims=True)
        iota = jax.lax.broadcasted_iota(jnp.int32, final.shape, 1)
        pred = jnp.min(jnp.where(final == mx, iota, c), axis=-1, keepdims=True)

        # ---- one lane-dense full-width store (order matches _out_layout) ----
        parts = [a, t, af, tf,                       # embeds (fusion = [af | tf])
                 final, alog, tlog, flog,            # logits
                 ens, ac, tc, mix,
                 pred.astype(jnp.float32)]
        if out_w > out_used:                         # lane padding rides in the same store
            parts.append(jnp.zeros((a.shape[0], out_w - out_used), jnp.float32))
        out_ref[...] = jnp.concatenate(parts, axis=-1)

    return kernel


# ------------------------------ param handling --------------------------------

def init_params(key, audio_size, text_size, hidden, num_classes):
    """Raw parameters (Linear weights pre-transposed to [in, out])."""
    h2 = hidden // 2
    keys = iter(jax.random.split(key, 64))

    def lin(in_f, out_f):
        w = jax.random.normal(next(keys), (in_f, out_f), jnp.float32) / jnp.sqrt(
            jnp.float32(in_f))
        b = jax.random.normal(next(keys), (1, out_f), jnp.float32) * 0.01
        return w, b

    p = {}
    p["ln_a_g"] = jnp.ones((1, audio_size), jnp.float32)
    p["ln_a_b"] = jnp.zeros((1, audio_size), jnp.float32)
    p["wa"], p["ba"] = lin(audio_size, hidden)
    p["wd1"], p["bd1"] = lin(hidden, hidden)
    p["wd2"], p["bd2"] = lin(hidden, hidden)
    wm1, p["bm1"] = lin(2 * hidden, h2)
    p["wm1_a"], p["wm1_d"] = wm1[:hidden], wm1[hidden:]
    p["wm2"], p["bm2"] = lin(h2, 1)
    p["ln_t_g"] = jnp.ones((1, text_size), jnp.float32)
    p["ln_t_b"] = jnp.zeros((1, text_size), jnp.float32)
    p["wt"], p["bt"] = lin(text_size, hidden)
    p["wac1"], p["bac1"] = lin(hidden, h2)
    p["wac2"], p["bac2"] = lin(h2, 1)
    p["wtc1"], p["btc1"] = lin(hidden, h2)
    p["wtc2"], p["btc2"] = lin(h2, 1)
    p["wacl"], p["bacl"] = lin(hidden, num_classes)
    p["wtcl"], p["btcl"] = lin(hidden, num_classes)
    wfcl, p["bfcl"] = lin(2 * hidden, num_classes)
    p["wfcl_a"], p["wfcl_t"] = wfcl[:hidden], wfcl[hidden:]
    wg1, p["bg1"] = lin(2 * hidden + 2, hidden)
    p["wg1_a"] = wg1[:hidden]
    p["wg1_t"] = wg1[hidden:2 * hidden]
    p["wg1_ac"] = wg1[2 * hidden:2 * hidden + 1]
    p["wg1_tc"] = wg1[2 * hidden + 1:2 * hidden + 2]
    p["wg2"], p["bg2"] = lin(hidden, 3)
    return p


def pack_params(params, audio_size, text_size, hidden, num_classes):
    """Pack ~40 raw params into 4 operands (once, outside the kernel).
    Matmul weights go to bf16 (f32 accumulation in-kernel); biases/LN stay f32."""
    vec_idx, vec_rows, vec_w = _vec_layout(audio_size, text_size, hidden,
                                           num_classes)
    col_off, _, w_cols = _w32_layout(hidden, num_classes)

    vals = dict(params)
    vals["wm2_row"] = params["wm2"].reshape(1, -1)      # (h2,1) -> (1,h2)
    vals["wac2_row"] = params["wac2"].reshape(1, -1)
    vals["wtc2_row"] = params["wtc2"].reshape(1, -1)

    vecs = jnp.zeros((vec_rows, vec_w), jnp.float32)
    for name, (row, width) in vec_idx.items():
        vecs = vecs.at[row, :width].set(vals[name].reshape(-1))

    w32 = jnp.zeros((hidden, w_cols), jnp.float32)
    for name, (start, width) in col_off.items():
        w32 = w32.at[:, start:start + width].set(vals[name])

    return {"wa": params["wa"].astype(jnp.bfloat16),
            "wt": params["wt"].astype(jnp.bfloat16),
            "w32": w32.astype(jnp.bfloat16),
            "vecs": vecs}


# --------------------------------- wrapper ------------------------------------

def robust_fusion_classifier(audio_emb, text_emb, packed, *, audio_size,
                             text_size, hidden, num_classes, tile_b=None):
    """tile_b=None -> whole (padded) batch in one grid step (best for small B
    and single-TC v5e/v6e).  For large B sweep tile_b in {64,128,256}; on v7x
    use tile_b = round_up(ceil(B/2), 8) so both TensorCores get one shard."""
    B = audio_emb.shape[0]
    if tile_b is None:
        tile_b = _round_up(B, 8)
    assert tile_b % 8 == 0, "tile_b must be a multiple of 8"
    Bp = _round_up(B, tile_b)
    if Bp != B:
        audio_emb = jnp.pad(audio_emb, ((0, Bp - B), (0, 0)))
        text_emb = jnp.pad(text_emb, ((0, Bp - B), (0, 0)))

    out_off, _, out_w = _out_layout(hidden, num_classes)
    vec_rows, vec_w = packed["vecs"].shape
    w_cols = packed["w32"].shape[1]

    kernel = _make_kernel(audio_size, text_size, hidden, num_classes)
    out = pl.pallas_call(
        kernel,
        out_shape=jax.ShapeDtypeStruct((Bp, out_w), jnp.float32),
        grid=(Bp // tile_b,),
        in_specs=[
            pl.BlockSpec((tile_b, audio_size), lambda b: (b, 0)),
            pl.BlockSpec((tile_b, text_size), lambda b: (b, 0)),
            # weights pinned to block (0,0): stay VMEM-resident across grid steps
            pl.BlockSpec((audio_size, hidden), lambda b: (0, 0)),
            pl.BlockSpec((text_size, hidden), lambda b: (0, 0)),
            pl.BlockSpec((hidden, w_cols), lambda b: (0, 0)),
            pl.BlockSpec((vec_rows, vec_w), lambda b: (0, 0)),
        ],
        out_specs=pl.BlockSpec((tile_b, out_w), lambda b: (b, 0)),
        compiler_params=pltpu.CompilerParams(
            dimension_semantics=("parallel",)),
    )(audio_emb, text_emb, packed["wa"], packed["wt"], packed["w32"],
      packed["vecs"])
    out = out[:B]

    def col(name):
        s, n = out_off[name]
        return out[:, s:s + n]

    return {
        "logits": col("logits"),
        "audio_logits": col("audio_logits"),
        "text_logits": col("text_logits"),
        "fusion_logits": col("fusion_logits"),
        "class_preds": col("class_preds")[:, 0].astype(jnp.int32),
        "audio_embed": col("audio_embed"),
        "text_embed": col("text_embed"),
        "fusion_embed": col("fusion_embed"),
        "audio_confidence": col("audio_confidence"),
        "text_confidence": col("text_confidence"),
        "ensemble_weights": col("ensemble_weights"),
        "audio_noise_mix_ratio": col("audio_noise_mix_ratio"),
    }


# ------------------------- pure-JAX reference (check) --------------------------

def reference_forward(audio_emb, text_emb, p):
    """f32, exact-erf GELU (torch semantics) -- used to bound bf16 / tanh-GELU drift."""
    def gelu(x):
        return 0.5 * x * (1.0 + jax.lax.erf(x * 0.7071067811865476))

    def ln(x, g, b, eps=1e-5):
        m = jnp.mean(x, -1, keepdims=True)
        v = jnp.mean((x - m) ** 2, -1, keepdims=True)
        return (x - m) * jax.lax.rsqrt(v + eps) * g + b

    a = gelu(ln(audio_emb, p["ln_a_g"], p["ln_a_b"]) @ p["wa"] + p["ba"])
    d = gelu(a @ p["wd1"] + p["bd1"]) @ p["wd2"] + p["bd2"]
    hm = jax.nn.relu(a @ p["wm1_a"] + d @ p["wm1_d"] + p["bm1"])
    mix = jax.nn.sigmoid(hm @ p["wm2"] + p["bm2"])
    a = mix * d + (1.0 - mix) * a
    t = gelu(ln(text_emb, p["ln_t_g"], p["ln_t_b"]) @ p["wt"] + p["bt"])
    ac = jax.nn.sigmoid(jax.nn.relu(a @ p["wac1"] + p["bac1"]) @ p["wac2"] + p["bac2"])
    tc = jax.nn.sigmoid(jax.nn.relu(t @ p["wtc1"] + p["btc1"]) @ p["wtc2"] + p["btc2"])
    af, tf = a * ac, t * tc
    alog = a @ p["wacl"] + p["bacl"]
    tlog = t @ p["wtcl"] + p["btcl"]
    flog = af @ p["wfcl_a"] + tf @ p["wfcl_t"] + p["bfcl"]
    g = jax.nn.relu(a @ p["wg1_a"] + t @ p["wg1_t"]
                    + ac * p["wg1_ac"] + tc * p["wg1_tc"] + p["bg1"])
    ens = jax.nn.softmax(g @ p["wg2"] + p["bg2"], axis=-1)
    final = ens[:, 0:1] * alog + ens[:, 1:2] * tlog + ens[:, 2:3] * flog
    return {"logits": final, "audio_logits": alog, "text_logits": tlog,
            "fusion_logits": flog, "audio_embed": a, "text_embed": t,
            "fusion_embed": jnp.concatenate([af, tf], -1),
            "audio_confidence": ac, "text_confidence": tc,
            "ensemble_weights": ens, "audio_noise_mix_ratio": mix}


# ----------------------------------- main --------------------------------------

if __name__ == "__main__":
    B, AUDIO, TEXT, HIDDEN, CLASSES = 16, 24, 40, 32, 6

    key = jax.random.PRNGKey(0)
    k_a, k_t, k_p = jax.random.split(key, 3)
    audio_emb = jax.random.normal(k_a, (B, AUDIO), jnp.float32)
    text_emb = jax.random.normal(k_t, (B, TEXT), jnp.float32)
    raw = init_params(k_p, AUDIO, TEXT, HIDDEN, CLASSES)
    packed = pack_params(raw, AUDIO, TEXT, HIDDEN, CLASSES)

    # tile_b=None -> whole batch, one grid step (grid=(1,))
    out = robust_fusion_classifier(
        audio_emb, text_emb, packed, audio_size=AUDIO, text_size=TEXT,
        hidden=HIDDEN, num_classes=CLASSES, tile_b=None)
    out = jax.block_until_ready(out)

    # correctness vs. exact-erf f32 reference (tolerance covers bf16 matmul
    # operands + tanh-approx GELU)
    ref = reference_forward(audio_emb, text_emb, raw)
    for name in ("logits", "audio_logits", "text_logits", "fusion_logits",
                 "audio_embed", "text_embed", "fusion_embed",
                 "audio_confidence", "text_confidence", "ensemble_weights",
                 "audio_noise_mix_ratio"):
        assert bool(jnp.allclose(out[name], ref[name], atol=5e-2, rtol=5e-2)), name
    assert bool(jnp.all(jnp.isfinite(out["logits"])))
    assert bool(jnp.allclose(jnp.sum(out["ensemble_weights"], axis=-1), 1.0,
                             atol=1e-5))
    assert bool(jnp.all(out["class_preds"] == jnp.argmax(out["logits"], axis=-1)))
    print("KERNEL_OK")
</pallas_src>

<mosaic_0001>
module attributes {stable_mosaic.version = 11 : i64} {
  func.func @kernel(%arg0: i32, %arg1: memref<16x24xf32, #tpu.memory_space<vmem>>, %arg2: memref<16x40xf32, #tpu.memory_space<vmem>>, %arg3: memref<24x32xbf16, #tpu.memory_space<vmem>>, %arg4: memref<40x32xbf16, #tpu.memory_space<vmem>>, %arg5: memref<32x768xbf16, #tpu.memory_space<vmem>>, %arg6: memref<24x128xf32, #tpu.memory_space<vmem>>, %arg7: memref<16x256xf32, #tpu.memory_space<vmem>>) attributes {dimension_semantics = [#tpu.dimension_semantics<parallel>], iteration_bounds = array<i64: 1>, scalar_prefetch = 0 : i64, scratch_operands = 0 : i64, tpu.core_type = #tpu.core_type<tc>, window_params = [{transform_indices = @transform_0, window_bounds = array<i64: 16, 24>}, {transform_indices = @transform_1, window_bounds = array<i64: 16, 40>}, {pipeline_mode = #tpu.pipeline_mode<synchronous>, transform_indices = @transform_2, window_bounds = array<i64: 24, 32>}, {pipeline_mode = #tpu.pipeline_mode<synchronous>, transform_indices = @transform_3, window_bounds = array<i64: 40, 32>}, {pipeline_mode = #tpu.pipeline_mode<synchronous>, transform_indices = @transform_4, window_bounds = array<i64: 32, 768>}, {pipeline_mode = #tpu.pipeline_mode<synchronous>, transform_indices = @transform_5, window_bounds = array<i64: 24, 128>}, {transform_indices = @transform_6, window_bounds = array<i64: 16, 256>}]} {
    %c0 = arith.constant 0 : index
    %c0_0 = arith.constant 0 : index
    %0 = vector.load %arg1[%c0, %c0_0] : memref<16x24xf32, #tpu.memory_space<vmem>>, vector<16x24xf32>
    %c0_1 = arith.constant 0 : index
    %c0_2 = arith.constant 0 : index
    %1 = vector.load %arg6[%c0_1, %c0_2] : memref<24x128xf32, #tpu.memory_space<vmem>>, vector<1x24xf32>
    %c1 = arith.constant 1 : index
    %c0_3 = arith.constant 0 : index
    %2 = vector.load %arg6[%c1, %c0_3] : memref<24x128xf32, #tpu.memory_space<vmem>>, vector<1x24xf32>
    %cst = arith.constant dense<0.000000e+00> : vector<16xf32>
    %3 = vector.multi_reduction <add>, %0, %cst [1] : vector<16x24xf32> to vector<16xf32>
    %4 = vector.shape_cast %3 : vector<16xf32> to vector<16x1xf32>
    %cst_4 = arith.constant 2.400000e+01 : f32
    %5 = vector.broadcast %cst_4 : f32 to vector<16x1xf32>
    %6 = arith.divf %4, %5 : vector<16x1xf32>
    %7 = vector.broadcast %6 : vector<16x1xf32> to vector<16x24xf32>
    %8 = arith.subf %0, %7 : vector<16x24xf32>
    %9 = arith.mulf %8, %8 : vector<16x24xf32>
    %cst_5 = arith.constant dense<0.000000e+00> : vector<16xf32>
    %10 = vector.multi_reduction <add>, %9, %cst_5 [1] : vector<16x24xf32> to vector<16xf32>
    %11 = vector.shape_cast %10 : vector<16xf32> to vector<16x1xf32>
    %cst_6 = arith.constant 2.400000e+01 : f32
    %12 = vector.broadcast %cst_6 : f32 to vector<16x1xf32>
    %13 = arith.divf %11, %12 : vector<16x1xf32>
    %14 = vector.broadcast %6 : vector<16x1xf32> to vector<16x24xf32>
    %15 = arith.subf %0, %14 : vector<16x24xf32>
    %cst_7 = arith.constant 9.99999974E-6 : f32
    %16 = vector.broadcast %cst_7 : f32 to vector<16x1xf32>
    %17 = arith.addf %13, %16 : vector<16x1xf32>
    %18 = math.rsqrt %17 : vector<16x1xf32>
    %19 = vector.broadcast %18 : vector<16x1xf32> to vector<16x24xf32>
    %20 = arith.mulf %15, %19 : vector<16x24xf32>
    %21 = vector.broadcast %1 : vector<1x24xf32> to vector<16x24xf32>
    %22 = arith.mulf %20, %21 : vector<16x24xf32>
    %23 = vector.broadcast %2 : vector<1x24xf32> to vector<16x24xf32>
    %24 = arith.addf %22, %23 : vector<16x24xf32>
    %c0_8 = arith.constant 0 : index
    %c0_9 = arith.constant 0 : index
    %25 = vector.load %arg3[%c0_8, %c0_9] : memref<24x32xbf16, #tpu.memory_space<vmem>>, vector<24x32xbf16>
    %26 = arith.truncf %24 : vector<16x24xf32> to vector<16x24xbf16>
    %cst_10 = arith.constant dense<0.000000e+00> : vector<16x32xf32>
    %27 = tpu.matmul %26, %25, %cst_10 {dimension_numbers = #tpu.dot_dimension_numbers<[1], [0], [0], [1], [0, 0, 1, 1], [], []>} : vector<16x24xbf16>, vector<24x32xbf16>, vector<16x32xf32> -> vector<16x32xf32>
    %c2 = arith.constant 2 : index
    %c0_11 = arith.constant 0 : index
    %28 = vector.load %arg6[%c2, %c0_11] : memref<24x128xf32, #tpu.memory_space<vmem>>, vector<1x32xf32>
    %29 = vector.broadcast %28 : vector<1x32xf32> to vector<16x32xf32>
    %30 = arith.addf %27, %29 : vector<16x32xf32>
    %cst_12 = arith.constant 5.000000e-01 : f32
    %31 = vector.broadcast %cst_12 : f32 to vector<16x32xf32>
    %32 = arith.mulf %31, %30 : vector<16x32xf32>
    %cst_13 = arith.constant 4.471500e-02 : f32
    %33 = vector.broadcast %cst_13 : f32 to vector<16x32xf32>
    %34 = arith.mulf %33, %30 : vector<16x32xf32>
    %35 = arith.mulf %34, %30 : vector<16x32xf32>
    %36 = arith.mulf %35, %30 : vector<16x32xf32>
    %37 = arith.addf %30, %36 : vector<16x32xf32>
    %cst_14 = arith.constant 0.797884583 : f32
    %38 = vector.broadcast %cst_14 : f32 to vector<16x32xf32>
    %39 = arith.mulf %38, %37 : vector<16x32xf32>
    %40 = math.tanh %39 : vector<16x32xf32>
    %cst_15 = arith.constant 1.000000e+00 : f32
    %41 = vector.broadcast %cst_15 : f32 to vector<16x32xf32>
    %42 = arith.addf %41, %40 : vector<16x32xf32>
    %43 = arith.mulf %32, %42 : vector<16x32xf32>
    %c0_16 = arith.constant 0 : index
    %c0_17 = arith.constant 0 : index
    %44 = vector.load %arg5[%c0_16, %c0_17] : memref<32x768xbf16, #tpu.memory_space<vmem>>, vector<32x128xbf16>
    %45 = arith.truncf %43 : vector<16x32xf32> to vector<16x32xbf16>
    %cst_18 = arith.constant dense<0.000000e+00> : vector<16x128xf32>
    %46 = tpu.matmul %45, %44, %cst_18 {dimension_numbers = #tpu.dot_dimension_numbers<[1], [0], [0], [1], [0, 0, 1, 1], [], []>} : vector<16x32xbf16>, vector<32x128xbf16>, vector<16x128xf32> -> vector<16x128xf32>
    %47 = vector.extract_strided_slice %46 {offsets = [0, 0], sizes = [16, 32], strides = [1, 1]} : vector<16x128xf32> to vector<16x32xf32>
    %c3 = arith.constant 3 : index
    %c0_19 = arith.constant 0 : index
    %48 = vector.load %arg6[%c3, %c0_19] : memref<24x128xf32, #tpu.memory_space<vmem>>, vector<1x32xf32>
    %49 = vector.broadcast %48 : vector<1x32xf32> to vector<16x32xf32>
    %50 = arith.addf %47, %49 : vector<16x32xf32>
    %cst_20 = arith.constant 5.000000e-01 : f32
    %51 = vector.broadcast %cst_20 : f32 to vector<16x32xf32>
    %52 = arith.mulf %51, %50 : vector<16x32xf32>
    %cst_21 = arith.constant 4.471500e-02 : f32
    %53 = vector.broadcast %cst_21 : f32 to vector<16x32xf32>
    %54 = arith.mulf %53, %50 : vector<16x32xf32>
    %55 = arith.mulf %54, %50 : vector<16x32xf32>
    %56 = arith.mulf %55, %50 : vector<16x32xf32>
    %57 = arith.addf %50, %56 : vector<16x32xf32>
    %cst_22 = arith.constant 0.797884583 : f32
    %58 = vector.broadcast %cst_22 : f32 to vector<16x32xf32>
    %59 = arith.mulf %58, %57 : vector<16x32xf32>
    %60 = math.tanh %59 : vector<16x32xf32>
    %cst_23 = arith.constant 1.000000e+00 : f32
    %61 = vector.broadcast %cst_23 : f32 to vector<16x32xf32>
    %62 = arith.addf %61, %60 : vector<16x32xf32>
    %63 = arith.mulf %52, %62 : vector<16x32xf32>
    %c0_24 = arith.constant 0 : index
    %c128 = arith.constant 128 : index
    %64 = vector.load %arg5[%c0_24, %c128] : memref<32x768xbf16, #tpu.memory_space<vmem>>, vector<32x128xbf16>
    %65 = arith.truncf %63 : vector<16x32xf32> to vector<16x32xbf16>
    %cst_25 = arith.constant dense<0.000000e+00> : vector<16x128xf32>
    %66 = tpu.matmul %65, %64, %cst_25 {dimension_numbers = #tpu.dot_dimension_numbers<[1], [0], [0], [1], [0, 0, 1, 1], [], []>} : vector<16x32xbf16>, vector<32x128xbf16>, vector<16x128xf32> -> vector<16x128xf32>
    %67 = vector.extract_strided_slice %66 {offsets = [0, 0], sizes = [16, 32], strides = [1, 1]} : vector<16x128xf32> to vector<16x32xf32>
    %c4 = arith.constant 4 : index
    %c0_26 = arith.constant 0 : index
    %68 = vector.load %arg6[%c4, %c0_26] : memref<24x128xf32, #tpu.memory_space<vmem>>, vector<1x32xf32>
    %69 = vector.broadcast %68 : vector<1x32xf32> to vector<16x32xf32>
    %70 = arith.addf %67, %69 : vector<16x32xf32>
    %71 = vector.extract_strided_slice %46 {offsets = [0, 32], sizes = [16, 16], strides = [1, 1]} : vector<16x128xf32> to vector<16x16xf32>
    %c0_27 = arith.constant 0 : index
    %c256 = arith.constant 256 : index
    %72 = vector.load %arg5[%c0_27, %c256] : memref<32x768xbf16, #tpu.memory_space<vmem>>, vector<32x128xbf16>
    %73 = arith.truncf %70 : vector<16x32xf32> to vector<16x32xbf16>
    %cst_28 = arith.constant dense<0.000000e+00> : vector<16x128xf32>
    %74 = tpu.matmul %73, %72, %cst_28 {dimension_numbers = #tpu.dot_dimension_numbers<[1], [0], [0], [1], [0, 0, 1, 1], [], []>} : vector<16x32xbf16>, vector<32x128xbf16>, vector<16x128xf32> -> vector<16x128xf32>
    %75 = vector.extract_strided_slice %74 {offsets = [0, 0], sizes = [16, 16], strides = [1, 1]} : vector<16x128xf32> to vector<16x16xf32>
    %76 = arith.addf %71, %75 : vector<16x16xf32>
    %c5 = arith.constant 5 : index
    %c0_29 = arith.constant 0 : index
    %77 = vector.load %arg6[%c5, %c0_29] : memref<24x128xf32, #tpu.memory_space<vmem>>, vector<1x16xf32>
    %78 = vector.broadcast %77 : vector<1x16xf32> to vector<16x16xf32>
    %79 = arith.addf %76, %78 : vector<16x16xf32>
    %cst_30 = arith.constant 0.000000e+00 : f32
    %80 = vector.broadcast %cst_30 : f32 to vector<16x16xf32>
    %81 = arith.maximumf %79, %80 : vector<16x16xf32>
    %c6 = arith.constant 6 : index
    %c0_31 = arith.constant 0 : index
    %82 = vector.load %arg6[%c6, %c0_31] : memref<24x128xf32, #tpu.memory_space<vmem>>, vector<1x16xf32>
    %c7 = arith.constant 7 : index
    %c0_32 = arith.constant 0 : index
    %83 = vector.load %arg6[%c7, %c0_32] : memref<24x128xf32, #tpu.memory_space<vmem>>, vector<1x1xf32>
    %84 = vector.broadcast %82 : vector<1x16xf32> to vector<16x16xf32>
    %85 = arith.mulf %81, %84 : vector<16x16xf32>
    %cst_33 = arith.constant dense<0.000000e+00> : vector<16xf32>
    %86 = vector.multi_reduction <add>, %85, %cst_33 [1] : vector<16x16xf32> to vector<16xf32>
    %87 = vector.shape_cast %86 : vector<16xf32> to vector<16x1xf32>
    %88 = vector.broadcast %83 : vector<1x1xf32> to vector<16x1xf32>
    %89 = arith.addf %87, %88 : vector<16x1xf32>
    %90 = arith.negf %89 : vector<16x1xf32>
    %91 = math.exp %90 : vector<16x1xf32>
    %cst_34 = arith.constant 1.000000e+00 : f32
    %92 = vector.broadcast %cst_34 : f32 to vector<16x1xf32>
    %93 = arith.addf %92, %91 : vector<16x1xf32>
    %94 = arith.divf %92, %93 : vector<16x1xf32>
    %95 = vector.broadcast %94 : vector<16x1xf32> to vector<16x32xf32>
    %96 = arith.mulf %95, %70 : vector<16x32xf32>
    %cst_35 = arith.constant 1.000000e+00 : f32
    %97 = vector.broadcast %cst_35 : f32 to vector<16x1xf32>
    %98 = arith.subf %97, %94 : vector<16x1xf32>
    %99 = vector.broadcast %98 : vector<16x1xf32> to vector<16x32xf32>
    %100 = arith.mulf %99, %43 : vector<16x32xf32>
    %101 = arith.addf %96, %100 : vector<16x32xf32>
    %c0_36 = arith.constant 0 : index
    %c0_37 = arith.constant 0 : index
    %102 = vector.load %arg2[%c0_36, %c0_37] : memref<16x40xf32, #tpu.memory_space<vmem>>, vector<16x40xf32>
    %c8 = arith.constant 8 : index
    %c0_38 = arith.constant 0 : index
    %103 = vector.load %arg6[%c8, %c0_38] : memref<24x128xf32, #tpu.memory_space<vmem>>, vector<1x40xf32>
    %c9 = arith.constant 9 : index
    %c0_39 = arith.constant 0 : index
    %104 = vector.load %arg6[%c9, %c0_39] : memref<24x128xf32, #tpu.memory_space<vmem>>, vector<1x40xf32>
    %cst_40 = arith.constant dense<0.000000e+00> : vector<16xf32>
    %105 = vector.multi_reduction <add>, %102, %cst_40 [1] : vector<16x40xf32> to vector<16xf32>
    %106 = vector.shape_cast %105 : vector<16xf32> to vector<16x1xf32>
    %cst_41 = arith.constant 4.000000e+01 : f32
    %107 = vector.broadcast %cst_41 : f32 to vector<16x1xf32>
    %108 = arith.divf %106, %107 : vector<16x1xf32>
    %109 = vector.broadcast %108 : vector<16x1xf32> to vector<16x40xf32>
    %110 = arith.subf %102, %109 : vector<16x40xf32>
    %111 = arith.mulf %110, %110 : vector<16x40xf32>
    %cst_42 = arith.constant dense<0.000000e+00> : vector<16xf32>
    %112 = vector.multi_reduction <add>, %111, %cst_42 [1] : vector<16x40xf32> to vector<16xf32>
    %113 = vector.shape_cast %112 : vector<16xf32> to vector<16x1xf32>
    %cst_43 = arith.constant 4.000000e+01 : f32
    %114 = vector.broadcast %cst_43 : f32 to vector<16x1xf32>
    %115 = arith.divf %113, %114 : vector<16x1xf32>
    %116 = vector.broadcast %108 : vector<16x1xf32> to vector<16x40xf32>
    %117 = arith.subf %102, %116 : vector<16x40xf32>
    %cst_44 = arith.constant 9.99999974E-6 : f32
    %118 = vector.broadcast %cst_44 : f32 to vector<16x1xf32>
    %119 = arith.addf %115, %118 : vector<16x1xf32>
    %120 = math.rsqrt %119 : vector<16x1xf32>
    %121 = vector.broadcast %120 : vector<16x1xf32> to vector<16x40xf32>
    %122 = arith.mulf %117, %121 : vector<16x40xf32>
    %123 = vector.broadcast %103 : vector<1x40xf32> to vector<16x40xf32>
    %124 = arith.mulf %122, %123 : vector<16x40xf32>
    %125 = vector.broadcast %104 : vector<1x40xf32> to vector<16x40xf32>
    %126 = arith.addf %124, %125 : vector<16x40xf32>
    %c0_45 = arith.constant 0 : index
    %c0_46 = arith.constant 0 : index
    %127 = vector.load %arg4[%c0_45, %c0_46] : memref<40x32xbf16, #tpu.memory_space<vmem>>, vector<40x32xbf16>
    %128 = arith.truncf %126 : vector<16x40xf32> to vector<16x40xbf16>
    %cst_47 = arith.constant dense<0.000000e+00> : vector<16x32xf32>
    %129 = tpu.matmul %128, %127, %cst_47 {dimension_numbers = #tpu.dot_dimension_numbers<[1], [0], [0], [1], [0, 0, 1, 1], [], []>} : vector<16x40xbf16>, vector<40x32xbf16>, vector<16x32xf32> -> vector<16x32xf32>
    %c10 = arith.constant 10 : index
    %c0_48 = arith.constant 0 : index
    %130 = vector.load %arg6[%c10, %c0_48] : memref<24x128xf32, #tpu.memory_space<vmem>>, vector<1x32xf32>
    %131 = vector.broadcast %130 : vector<1x32xf32> to vector<16x32xf32>
    %132 = arith.addf %129, %131 : vector<16x32xf32>
    %cst_49 = arith.constant 5.000000e-01 : f32
    %133 = vector.broadcast %cst_49 : f32 to vector<16x32xf32>
    %134 = arith.mulf %133, %132 : vector<16x32xf32>
    %cst_50 = arith.constant 4.471500e-02 : f32
    %135 = vector.broadcast %cst_50 : f32 to vector<16x32xf32>
    %136 = arith.mulf %135, %132 : vector<16x32xf32>
    %137 = arith.mulf %136, %132 : vector<16x32xf32>
    %138 = arith.mulf %137, %132 : vector<16x32xf32>
    %139 = arith.addf %132, %138 : vector<16x32xf32>
    %cst_51 = arith.constant 0.797884583 : f32
    %140 = vector.broadcast %cst_51 : f32 to vector<16x32xf32>
    %141 = arith.mulf %140, %139 : vector<16x32xf32>
    %142 = math.tanh %141 : vector<16x32xf32>
    %cst_52 = arith.constant 1.000000e+00 : f32
    %143 = vector.broadcast %cst_52 : f32 to vector<16x32xf32>
    %144 = arith.addf %143, %142 : vector<16x32xf32>
    %145 = arith.mulf %134, %144 : vector<16x32xf32>
    %c0_53 = arith.constant 0 : index
    %c384 = arith.constant 384 : index
    %146 = vector.load %arg5[%c0_53, %c384] : memref<32x768xbf16, #tpu.memory_space<vmem>>, vector<32x128xbf16>
    %147 = arith.truncf %101 : vector<16x32xf32> to vector<16x32xbf16>
    %cst_54 = arith.constant dense<0.000000e+00> : vector<16x128xf32>
    %148 = tpu.matmul %147, %146, %cst_54 {dimension_numbers = #tpu.dot_dimension_numbers<[1], [0], [0], [1], [0, 0, 1, 1], [], []>} : vector<16x32xbf16>, vector<32x128xbf16>, vector<16x128xf32> -> vector<16x128xf32>
    %149 = vector.extract_strided_slice %148 {offsets = [0, 0], sizes = [16, 16], strides = [1, 1]} : vector<16x128xf32> to vector<16x16xf32>
    %c11 = arith.constant 11 : index
    %c0_55 = arith.constant 0 : index
    %150 = vector.load %arg6[%c11, %c0_55] : memref<24x128xf32, #tpu.memory_space<vmem>>, vector<1x16xf32>
    %151 = vector.broadcast %150 : vector<1x16xf32> to vector<16x16xf32>
    %152 = arith.addf %149, %151 : vector<16x16xf32>
    %cst_56 = arith.constant 0.000000e+00 : f32
    %153 = vector.broadcast %cst_56 : f32 to vector<16x16xf32>
    %154 = arith.maximumf %152, %153 : vector<16x16xf32>
    %c12 = arith.constant 12 : index
    %c0_57 = arith.constant 0 : index
    %155 = vector.load %arg6[%c12, %c0_57] : memref<24x128xf32, #tpu.memory_space<vmem>>, vector<1x16xf32>
    %c13 = arith.constant 13 : index
    %c0_58 = arith.constant 0 : index
    %156 = vector.load %arg6[%c13, %c0_58] : memref<24x128xf32, #tpu.memory_space<vmem>>, vector<1x1xf32>
    %157 = vector.broadcast %155 : vector<1x16xf32> to vector<16x16xf32>
    %158 = arith.mulf %154, %157 : vector<16x16xf32>
    %cst_59 = arith.constant dense<0.000000e+00> : vector<16xf32>
    %159 = vector.multi_reduction <add>, %158, %cst_59 [1] : vector<16x16xf32> to vector<16xf32>
    %160 = vector.shape_cast %159 : vector<16xf32> to vector<16x1xf32>
    %161 = vector.broadcast %156 : vector<1x1xf32> to vector<16x1xf32>
    %162 = arith.addf %160, %161 : vector<16x1xf32>
    %163 = arith.negf %162 : vector<16x1xf32>
    %164 = math.exp %163 : vector<16x1xf32>
    %cst_60 = arith.constant 1.000000e+00 : f32
    %165 = vector.broadcast %cst_60 : f32 to vector<16x1xf32>
    %166 = arith.addf %165, %164 : vector<16x1xf32>
    %167 = arith.divf %165, %166 : vector<16x1xf32>
    %168 = vector.extract_strided_slice %148 {offsets = [0, 16], sizes = [16, 6], strides = [1, 1]} : vector<16x128xf32> to vector<16x6xf32>
    %c17 = arith.constant 17 : index
    %c0_61 = arith.constant 0 : index
    %169 = vector.load %arg6[%c17, %c0_61] : memref<24x128xf32, #tpu.memory_space<vmem>>, vector<1x6xf32>
    %170 = vector.broadcast %169 : vector<1x6xf32> to vector<16x6xf32>
    %171 = arith.addf %168, %170 : vector<16x6xf32>
    %172 = vector.extract_strided_slice %148 {offsets = [0, 22], sizes = [16, 6], strides = [1, 1]} : vector<16x128xf32> to vector<16x6xf32>
    %173 = vector.extract_strided_slice %148 {offsets = [0, 28], sizes = [16, 32], strides = [1, 1]} : vector<16x128xf32> to vector<16x32xf32>
    %c0_62 = arith.constant 0 : index
    %c512 = arith.constant 512 : index
    %174 = vector.load %arg5[%c0_62, %c512] : memref<32x768xbf16, #tpu.memory_space<vmem>>, vector<32x128xbf16>
    %175 = arith.truncf %145 : vector<16x32xf32> to vector<16x32xbf16>
    %cst_63 = arith.constant dense<0.000000e+00> : vector<16x128xf32>
    %176 = tpu.matmul %175, %174, %cst_63 {dimension_numbers = #tpu.dot_dimension_numbers<[1], [0], [0], [1], [0, 0, 1, 1], [], []>} : vector<16x32xbf16>, vector<32x128xbf16>, vector<16x128xf32> -> vector<16x128xf32>
    %177 = vector.extract_strided_slice %176 {offsets = [0, 0], sizes = [16, 16], strides = [1, 1]} : vector<16x128xf32> to vector<16x16xf32>
    %c14 = arith.constant 14 : index
    %c0_64 = arith.constant 0 : index
    %178 = vector.load %arg6[%c14, %c0_64] : memref<24x128xf32, #tpu.memory_space<vmem>>, vector<1x16xf32>
    %179 = vector.broadcast %178 : vector<1x16xf32> to vector<16x16xf32>
    %180 = arith.addf %177, %179 : vector<16x16xf32>
    %cst_65 = arith.constant 0.000000e+00 : f32
    %181 = vector.broadcast %cst_65 : f32 to vector<16x16xf32>
    %182 = arith.maximumf %180, %181 : vector<16x16xf32>
    %c15 = arith.constant 15 : index
    %c0_66 = arith.constant 0 : index
    %183 = vector.load %arg6[%c15, %c0_66] : memref<24x128xf32, #tpu.memory_space<vmem>>, vector<1x16xf32>
    %c16 = arith.constant 16 : index
    %c0_67 = arith.constant 0 : index
    %184 = vector.load %arg6[%c16, %c0_67] : memref<24x128xf32, #tpu.memory_space<vmem>>, vector<1x1xf32>
    %185 = vector.broadcast %183 : vector<1x16xf32> to vector<16x16xf32>
    %186 = arith.mulf %182, %185 : vector<16x16xf32>
    %cst_68 = arith.constant dense<0.000000e+00> : vector<16xf32>
    %187 = vector.multi_reduction <add>, %186, %cst_68 [1] : vector<16x16xf32> to vector<16xf32>
    %188 = vector.shape_cast %187 : vector<16xf32> to vector<16x1xf32>
    %189 = vector.broadcast %184 : vector<1x1xf32> to vector<16x1xf32>
    %190 = arith.addf %188, %189 : vector<16x1xf32>
    %191 = arith.negf %190 : vector<16x1xf32>
    %192 = math.exp %191 : vector<16x1xf32>
    %cst_69 = arith.constant 1.000000e+00 : f32
    %193 = vector.broadcast %cst_69 : f32 to vector<16x1xf32>
    %194 = arith.addf %193, %192 : vector<16x1xf32>
    %195 = arith.divf %193, %194 : vector<16x1xf32>
    %196 = vector.extract_strided_slice %176 {offsets = [0, 16], sizes = [16, 6], strides = [1, 1]} : vector<16x128xf32> to vector<16x6xf32>
    %c18 = arith.constant 18 : index
    %c0_70 = arith.constant 0 : index
    %197 = vector.load %arg6[%c18, %c0_70] : memref<24x128xf32, #tpu.memory_space<vmem>>, vector<1x6xf32>
    %198 = vector.broadcast %197 : vector<1x6xf32> to vector<16x6xf32>
    %199 = arith.addf %196, %198 : vector<16x6xf32>
    %200 = vector.extract_strided_slice %176 {offsets = [0, 22], sizes = [16, 6], strides = [1, 1]} : vector<16x128xf32> to vector<16x6xf32>
    %201 = vector.extract_strided_slice %176 {offsets = [0, 28], sizes = [16, 32], strides = [1, 1]} : vector<16x128xf32> to vector<16x32xf32>
    %202 = vector.broadcast %167 : vector<16x1xf32> to vector<16x32xf32>
    %203 = arith.mulf %101, %202 : vector<16x32xf32>
    %204 = vector.broadcast %195 : vector<16x1xf32> to vector<16x32xf32>
    %205 = arith.mulf %145, %204 : vector<16x32xf32>
    %206 = vector.broadcast %167 : vector<16x1xf32> to vector<16x6xf32>
    %207 = arith.mulf %206, %172 : vector<16x6xf32>
    %208 = vector.broadcast %195 : vector<16x1xf32> to vector<16x6xf32>
    %209 = arith.mulf %208, %200 : vector<16x6xf32>
    %210 = arith.addf %207, %209 : vector<16x6xf32>
    %c19 = arith.constant 19 : index
    %c0_71 = arith.constant 0 : index
    %211 = vector.load %arg6[%c19, %c0_71] : memref<24x128xf32, #tpu.memory_space<vmem>>, vector<1x6xf32>
    %212 = vector.broadcast %211 : vector<1x6xf32> to vector<16x6xf32>
    %213 = arith.addf %210, %212 : vector<16x6xf32>
    %214 = arith.addf %173, %201 : vector<16x32xf32>
    %c20 = arith.constant 20 : index
    %c0_72 = arith.constant 0 : index
    %215 = vector.load %arg6[%c20, %c0_72] : memref<24x128xf32, #tpu.memory_space<vmem>>, vector<1x32xf32>
    %216 = vector.broadcast %167 : vector<16x1xf32> to vector<16x32xf32>
    %217 = vector.broadcast %215 : vector<1x32xf32> to vector<16x32xf32>
    %218 = arith.mulf %216, %217 : vector<16x32xf32>
    %219 = arith.addf %214, %218 : vector<16x32xf32>
    %c21 = arith.constant 21 : index
    %c0_73 = arith.constant 0 : index
    %220 = vector.load %arg6[%c21, %c0_73] : memref<24x128xf32, #tpu.memory_space<vmem>>, vector<1x32xf32>
    %221 = vector.broadcast %195 : vector<16x1xf32> to vector<16x32xf32>
    %222 = vector.broadcast %220 : vector<1x32xf32> to vector<16x32xf32>
    %223 = arith.mulf %221, %222 : vector<16x32xf32>
    %224 = arith.addf %219, %223 : vector<16x32xf32>
    %c22 = arith.constant 22 : index
    %c0_74 = arith.constant 0 : index
    %225 = vector.load %arg6[%c22, %c0_74] : memref<24x128xf32, #tpu.memory_space<vmem>>, vector<1x32xf32>
    %226 = vector.broadcast %225 : vector<1x32xf32> to vector<16x32xf32>
    %227 = arith.addf %224, %226 : vector<16x32xf32>
    %cst_75 = arith.constant 0.000000e+00 : f32
    %228 = vector.broadcast %cst_75 : f32 to vector<16x32xf32>
    %229 = arith.maximumf %227, %228 : vector<16x32xf32>
    %c0_76 = arith.constant 0 : index
    %c640 = arith.constant 640 : index
    %230 = vector.load %arg5[%c0_76, %c640] : memref<32x768xbf16, #tpu.memory_space<vmem>>, vector<32x128xbf16>
    %231 = arith.truncf %229 : vector<16x32xf32> to vector<16x32xbf16>
    %cst_77 = arith.constant dense<0.000000e+00> : vector<16x128xf32>
    %232 = tpu.matmul %231, %230, %cst_77 {dimension_numbers = #tpu.dot_dimension_numbers<[1], [0], [0], [1], [0, 0, 1, 1], [], []>} : vector<16x32xbf16>, vector<32x128xbf16>, vector<16x128xf32> -> vector<16x128xf32>
    %233 = vector.extract_strided_slice %232 {offsets = [0, 0], sizes = [16, 3], strides = [1, 1]} : vector<16x128xf32> to vector<16x3xf32>
    %c23 = arith.constant 23 : index
    %c0_78 = arith.constant 0 : index
    %234 = vector.load %arg6[%c23, %c0_78] : memref<24x128xf32, #tpu.memory_space<vmem>>, vector<1x3xf32>
    %235 = vector.broadcast %234 : vector<1x3xf32> to vector<16x3xf32>
    %236 = arith.addf %233, %235 : vector<16x3xf32>
    %cst_79 = arith.constant dense<0xFF800000> : vector<16xf32>
    %237 = vector.multi_reduction <maximumf>, %236, %cst_79 [1] : vector<16x3xf32> to vector<16xf32>
    %238 = vector.shape_cast %237 : vector<16xf32> to vector<16x1xf32>
    %239 = vector.broadcast %238 : vector<16x1xf32> to vector<16x3xf32>
    %240 = arith.subf %236, %239 : vector<16x3xf32>
    %241 = math.exp %240 : vector<16x3xf32>
    %cst_80 = arith.constant dense<0.000000e+00> : vector<16xf32>
    %242 = vector.multi_reduction <add>, %241, %cst_80 [1] : vector<16x3xf32> to vector<16xf32>
    %243 = vector.shape_cast %242 : vector<16xf32> to vector<16x1xf32>
    %244 = vector.broadcast %243 : vector<16x1xf32> to vector<16x3xf32>
    %245 = arith.divf %241, %244 : vector<16x3xf32>
    %246 = vector.extract_strided_slice %245 {offsets = [0, 0], sizes = [16, 1], strides = [1, 1]} : vector<16x3xf32> to vector<16x1xf32>
    %247 = vector.broadcast %246 : vector<16x1xf32> to vector<16x6xf32>
    %248 = arith.mulf %247, %171 : vector<16x6xf32>
    %249 = vector.extract_strided_slice %245 {offsets = [0, 1], sizes = [16, 1], strides = [1, 1]} : vector<16x3xf32> to vector<16x1xf32>
    %250 = vector.broadcast %249 : vector<16x1xf32> to vector<16x6xf32>
    %251 = arith.mulf %250, %199 : vector<16x6xf32>
    %252 = arith.addf %248, %251 : vector<16x6xf32>
    %253 = vector.extract_strided_slice %245 {offsets = [0, 2], sizes = [16, 1], strides = [1, 1]} : vector<16x3xf32> to vector<16x1xf32>
    %254 = vector.broadcast %253 : vector<16x1xf32> to vector<16x6xf32>
    %255 = arith.mulf %254, %213 : vector<16x6xf32>
    %256 = arith.addf %252, %255 : vector<16x6xf32>
    %cst_81 = arith.constant dense<0xFF800000> : vector<16xf32>
    %257 = vector.multi_reduction <maximumf>, %256, %cst_81 [1] : vector<16x6xf32> to vector<16xf32>
    %258 = vector.shape_cast %257 : vector<16xf32> to vector<16x1xf32>
    %259 = tpu.iota {dimensions = array<i32: 1>} : vector<16x6xi32>
    %260 = vector.broadcast %258 : vector<16x1xf32> to vector<16x6xf32>
    %261 = arith.cmpf oeq, %256, %260 : vector<16x6xf32>
    %c6_i32 = arith.constant 6 : i32
    %262 = vector.broadcast %c6_i32 : i32 to vector<16x6xi32>
    %263 = arith.select %261, %259, %262 : vector<16x6xi1>, vector<16x6xi32>
    %cst_82 = arith.constant dense<2147483647> : vector<16xi32>
    %264 = vector.multi_reduction <minsi>, %263, %cst_82 [1] : vector<16x6xi32> to vector<16xi32>
    %265 = vector.shape_cast %264 : vector<16xi32> to vector<16x1xi32>
    %266 = arith.sitofp %265 : vector<16x1xi32> to vector<16x1xf32>
    %cst_83 = arith.constant 0.000000e+00 : f32
    %267 = vector.broadcast %cst_83 : f32 to vector<16x97xf32>
    %268 = tpu.concatenate %101, %145, %203, %205, %256, %171, %199, %213, %245, %167, %195, %94, %266, %267 in 1 : vector<16x32xf32>, vector<16x32xf32>, vector<16x32xf32>, vector<16x32xf32>, vector<16x6xf32>, vector<16x6xf32>, vector<16x6xf32>, vector<16x6xf32>, vector<16x3xf32>, vector<16x1xf32>, vector<16x1xf32>, vector<16x1xf32>, vector<16x1xf32>, vector<16x97xf32> -> vector<16x256xf32>
    %c0_84 = arith.constant 0 : index
    %c0_85 = arith.constant 0 : index
    %269 = vector.load %arg7[%c0_84, %c0_85] : memref<16x256xf32, #tpu.memory_space<vmem>>, vector<16x256xf32>
    tpu.vector_store %arg7[%c0_84, %c0_85], %268 {strides = array<i32>} : memref<16x256xf32, #tpu.memory_space<vmem>>, vector<16x256xf32>,
    return
  }
  func.func @transform_0(%arg0: i32) -> (i32, i32) {
    %c0_i32 = arith.constant 0 : i32
    %c0_i32_0 = arith.constant 0 : i32
    return %arg0, %c0_i32 : i32, i32
  }
  func.func @transform_1(%arg0: i32) -> (i32, i32) {
    %c0_i32 = arith.constant 0 : i32
    %c0_i32_0 = arith.constant 0 : i32
    return %arg0, %c0_i32 : i32, i32
  }
  func.func @transform_2(%arg0: i32) -> (i32, i32) {
    %c0_i32 = arith.constant 0 : i32
    %c0_i32_0 = arith.constant 0 : i32
    %c0_i32_1 = arith.constant 0 : i32
    return %c0_i32, %c0_i32_0 : i32, i32
  }
  func.func @transform_3(%arg0: i32) -> (i32, i32) {
    %c0_i32 = arith.constant 0 : i32
    %c0_i32_0 = arith.constant 0 : i32
    %c0_i32_1 = arith.constant 0 : i32
    return %c0_i32, %c0_i32_0 : i32, i32
  }
  func.func @transform_4(%arg0: i32) -> (i32, i32) {
    %c0_i32 = arith.constant 0 : i32
    %c0_i32_0 = arith.constant 0 : i32
    %c0_i32_1 = arith.constant 0 : i32
    return %c0_i32, %c0_i32_0 : i32, i32
  }
  func.func @transform_5(%arg0: i32) -> (i32, i32) {
    %c0_i32 = arith.constant 0 : i32
    %c0_i32_0 = arith.constant 0 : i32
    %c0_i32_1 = arith.constant 0 : i32
    return %c0_i32, %c0_i32_0 : i32, i32
  }
  func.func @transform_6(%arg0: i32) -> (i32, i32) {
    %c0_i32 = arith.constant 0 : i32
    %c0_i32_0 = arith.constant 0 : i32
    return %arg0, %c0_i32 : i32, i32
  }
}

</mosaic_0001>

<bundles_post_ra>
// kernel: tpu_custom_call.1
= control target key start
LH: loop header
LB: loop body
LE: loop exit
PB: predicated region body
PF: predicated region fallthrough
CT: control target
= control target key end

     0   :  { %11 = vsyncpa [#allocation3], 0  ;;  %s2026_s0 = inlined_call_operand.vmem [shape: f32[16,24], index: 0, kind: input, shape index: {}]   ;;  %s2027_s1 = inlined_call_operand.hbm [shape: f32[16,40], index: 1, kind: input, shape index: {}]   ;;  %s2028_s2 = inlined_call_operand.hbm [shape: bf16[24,32], index: 2, kind: input, shape index: {}]   ;;  %s2029_s3 = inlined_call_operand.vmem [shape: bf16[40,32], index: 3, kind: input, shape index: {}]   ;;  %s2030_s4 = inlined_call_operand.hbm [shape: bf16[32,768], index: 4, kind: input, shape index: {}]   ;;  %s2031_s5 = inlined_call_operand.vmem [shape: f32[24,128], index: 5, kind: input, shape index: {}]   ;;  %s2032_s6 = inlined_call_operand.hbm [shape: f32[16,256], index: 6, kind: output, shape index: {}]  }
   0x1   :  { %12 = vsyncpa [#allocation6], 0 }
   0x2   :  { %13 = vsyncpa [#allocation4], 0  ;;  %s1615_s21 = smov [#allocation5]  }
   0x3   :  { %s33_s22 = sshll.u32 %s1615_s21, 4  ;;  %s34_s22 = int_to_ptr.vmem [resolvable:$true] %s33_s22 }
   0x4   :  { %s1537_s23 = scalar_lea.vmem %s34_s22, 192  ;;  %p1542_p1 = scmp.lt.s32.totalorder %s34_s22, %s34_s22 }
   0x5   :  { %p1538_p0 = scmp.ne.s32.totalorder %s34_s22, %s1537_s23  ;;  %p1543_p2 = scmp.lt.s32.totalorder %s1537_s23, %s1537_s23 }
   0x7   :  { %p1544_p3 = por %p1543_p2, %p1542_p1 }
   0x9   :  { %p1545_p4 = pnand %p1544_p3, %p1538_p0 }
   0xb   :  { %1548 = shalt.err (!%p1545_p4)
}
   0xc   :  { %s1616_s24 = smov 64   ;;  %s1617_s25 = smov 4  }
   0xd   :  { %39 = dma.hbm_to_vmem [thread:$0]  %s2028_s2, 192, %s34_s22, [#allocation6], %s1616_s24, %s1616_s24, %s1617_s25  }
   0xe   :  { %s1618_s28 = smov [#allocation2]  }
   0xf   :  { %s21_s29 = sshll.u32 %s1618_s28, 4  ;;  %s22_s29 = int_to_ptr.vmem [resolvable:$true] %s21_s29 }
  0x10   :  { %s1557_s30 = scalar_lea.vmem %s22_s29, 256  ;;  %p1562_p6 = scmp.lt.s32.totalorder %s22_s29, %s22_s29 }
  0x11   :  { %p1558_p5 = scmp.ne.s32.totalorder %s22_s29, %s1557_s30  ;;  %p1563_p7 = scmp.lt.s32.totalorder %s1557_s30, %s1557_s30 }
  0x13   :  { %p1564_p8 = por %p1563_p7, %p1562_p6 }
  0x15   :  { %p1565_p9 = pnand %p1564_p8, %p1558_p5 }
  0x17   :  { %1568 = shalt.err (!%p1565_p9)
}
  0x18   :  { %s1619_s7 = smov 128   ;;  %s1620_s8 = smov 8  }
  0x19   :  { %27 = dma.hbm_to_vmem [thread:$0]  %s2027_s1, 256, %s22_s29, [#allocation3], %s1619_s7, %s1619_s7, %s1620_s8  }
  0x1a   :  { %s1621_s11 = smov [#allocation7]  }
  0x1b   :  { %s47_s12 = sshll.u32 %s1621_s11, 4  ;;  %s48_s12 = int_to_ptr.vmem [resolvable:$true] %s47_s12 }
  0x1c   :  { %s1577_s2 = scalar_lea.vmem %s48_s12, 1536  ;;  %p1582_p11 = scmp.lt.s32.totalorder %s48_s12, %s48_s12 }
  0x1d   :  { %p1578_p10 = scmp.ne.s32.totalorder %s48_s12, %s1577_s2  ;;  %p1583_p12 = scmp.lt.s32.totalorder %s1577_s2, %s1577_s2 }
  0x1f   :  { %p1584_p13 = por %p1583_p12, %p1582_p11 }
  0x21   :  { %p1585_p0 = pnand %p1584_p13, %p1578_p10 }
  0x23   :  { %1588 = shalt.err (!%p1585_p0)
}
  0x24   :  { %s1622_s13 = smov 384   ;;  %s1623_s14 = smov 24  }
  0x25   :  { %53 = dma.hbm_to_vmem [thread:$0]  %s2030_s4, 1536, %s48_s12, [#allocation6], %s1622_s13, %s1622_s13, %s1623_s14  }
  0x26   :  { %1609 = dma.done.wait [#allocation3], 256  }
  0x27   :  { %1610 = vsyncadd [#allocation3], 4294967040 }
  0x28   :  { %1611 = dma.done.wait [#allocation6], 1728  }
  0x29   :  { %1612 = vsyncadd [#allocation6], 4294965568  ;;  %vm70_vm0 = vcmask 195584   ;;  %v66_v0 = vld [vmem:[%s2026_s0] sm:$0xff]  ;;  %v67_v1 = vld [vmem:[%s2026_s0 + $0x8] sm:$0xff]  ;;  %vm131_vm1 = vcmask 1043456  }
  0x2a   :  { %v71_v2 = vsel %vm70_vm0, %v66_v0, 0.0  ;;  %v74_v3 = vsel %vm70_vm0, %v67_v1, 0.0  ;;  %v1460_v14 = vld [vmem:[#allocation5 + $0x8] ss:$0 sps:$4 sm:$0xff]   ;;  %v1624_v15 = vmov 0.0   ;;  %vm1625_vm2 = vmmov 0  }
  0x2b   :  { %72 = vadd.xlane.f32.xlu0 %v71_v2  ;;  %1358 = vmatprep.subr.bf16.mxu0 %v1624_v15  ;;  %v133_v16 = vsel %vm131_vm1, %v1460_v14, 0  ;;  %v1462_v17 = vld [vmem:[#allocation5] sm:$0xff]   ;;  %v1278_v26 = vld [vmem:[%s2031_s5] ss:$0 sm:$0xff]  ;;  %v1279_v30 = vld [vmem:[%s2031_s5 + $0x1] ss:$0 sm:$0xff] }
  0x2c   :  { %1366 = vmatprep.subr.bf16.mxu1 %v1624_v15  ;;  %1362 = vmatprep.mubr.msk.bf16.mxu0 %vm1625_vm2, %v1624_v15  ;;  %v1463_v35 = vld [vmem:[#allocation7 + $0x30] ss:$24 sps:$4 sm:$0xff]   ;;  %v1464_v36 = vld [vmem:[#allocation7] ss:$24 sps:$4 sm:$0xff]   ;;  %v1280_v37 = vld [vmem:[%s2031_s5 + $0x2] ss:$0 sm:$0xff] }
  0x2d   :  { %1370 = vmatprep.mubr.msk.bf16.mxu1 %vm1625_vm2, %v1624_v15  ;;  %1359 = vmatpush3.bf16.msra.mxu0 %v133_v16  ;;  %vm211_vm3 = vcmask 261120   ;;  %v1465_v63 = vld [vmem:[#allocation7 + $0x34] ss:$24 sps:$4 sm:$0xff]   ;;  %vm510_vm4 = vcmask 326656   ;;  %s1626_s13 = smov 32   ;;  %s1627_s18 = smov 96  }
  0x2e   :  { %1360 = vmatprep.subr.bf16.mxu0 %v1624_v15  ;;  %1367 = vmatpush3.bf16.msra.mxu1 %v1463_v35  ;;  %v507_v2 = vld [vmem:[#allocation2 + $0x8] sm:$0xff]  ;;  %vm453_vm5 = vcmask 130048   ;;  %s1629_s11 = smov 28   ;;  %s1630_s1 = smov 100   ;;  %vm1028_vm6 = vcmask 23552   ;;  %vm1095_vm7 = vcmask 179328  }
  0x2f   :  { %75 = vadd.xlane.f32.xlu0 %v74_v3  ;;  %1368 = vmatprep.subr.bf16.mxu1 %v1624_v15  ;;  %s1632_s20 = smov 22   ;;  %s1634_s23 = smov 16   ;;  %vm1230_vm9 = vcmask 48128   ;;  %vm1233_vm10 = vcmask 97280   ;;  %vm1236_vm11 = vcmask 146432   ;;  %vm1241_vm12 = vcmask 220160  }
  0x30   :  { %s1636_s27 = smov 112   ;;  %s1637_s28 = smov 118   ;;  %vm1244_vm14 = vcmask 228352   ;;  %vm1247_vm15 = vcmask 236544  }
  0x31   :  { %1361 = vmatpush3.bf16.msra.mxu0 %v1462_v17  ;;  %s1638_s29 = smov 124   ;;  %s1639_s30 = smov 27  }
  0x32   :  { %1374 = vmatprep.subr.bf16.mxu0 %v1624_v15  ;;  %1369 = vmatpush3.bf16.msra.mxu1 %v1464_v36  ;;  %s1640_s7 = smov 29  }
  0x33   :  { %1382 = vmatprep.subr.bf16.mxu1 %v1624_v15 }
  0xb4   :  { %v73_v4 = vpop.xlane.xlu0 %72 }
  0xb5   :  { %v78_v5 = vmul.f32 0.041666668, %v73_v4  ;;  %v514_v4 = vsel %vm510_vm4, %v507_v2, 0.0 }
  0xb7   :  { %v80_v6 = vsub.f32 %v66_v0, %v78_v5  ;;  %v1466_v0 = vld [vmem:[#allocation7 + $0x4] ss:$24 sps:$4 sm:$0xff]  }
  0xb8   :  { %v76_v7 = vpop.xlane.xlu0 %75  ;;  %v1287_v5 = vld [vmem:[%s2031_s5 + $0x3] ss:$0 sm:$0xff] }
  0xb9   :  { %v79_v8 = vmul.f32 0.041666668, %v76_v7  ;;  %v82_v9 = vmul.f32 %v80_v6, %v80_v6 }
  0xbb   :  { %v81_v10 = vsub.f32 %v67_v1, %v79_v8  ;;  %v84_v11 = vsel %vm70_vm0, %v82_v9, 0.0  ;;  %v506_v1 = vld [vmem:[#allocation2] sm:$0xff] }
  0xbc   :  { %85 = vadd.xlane.f32.xlu1 %v84_v11  ;;  %v511_v3 = vsel %vm510_vm4, %v506_v1, 0.0 }
  0xbd   :  { %v83_v12 = vmul.f32 %v81_v10, %v81_v10  ;;  %512 = vadd.xlane.f32.xlu0 %v511_v3 }
  0xbf   :  { %v87_v13 = vsel %vm70_vm0, %v83_v12, 0.0 }
  0xc0   :  { %88 = vadd.xlane.f32.xlu1 %v87_v13 }
  0xc4   :  { %515 = vadd.xlane.f32.xlu1 %v514_v4  ;;  %v1291_v4 = vld [vmem:[%s2031_s5 + $0x4] ss:$0 sm:$0xff] }
 0x145   :  { %v86_v18 = vpop.xlane.xlu1 %85 }
 0x146   :  { %v90_v19 = vmul.f32 0.041666668, %v86_v18  ;;  %v513_v35 = vpop.xlane.xlu0 %512 }
 0x148   :  { %v92_v20 = vadd.f32 1e-05, %v90_v19 }
 0x149   :  { %v89_v21 = vpop.xlane.xlu1 %88 }
 0x14a   :  { %1477 = vrsqrt.f32 %v92_v20  ;;  %v91_v22 = vmul.f32 0.041666668, %v89_v21 }
 0x14c   :  { %v93_v23 = vadd.f32 1e-05, %v91_v22 }
 0x14e   :  { %1479 = vrsqrt.f32 %v93_v23 }
 0x157   :  { %v1478_v24 = vpop.eup %1477 }
 0x158   :  { %v96_v25 = vmul.f32 %v1478_v24, %v80_v6 }
 0x15a   :  { %v102_v29 = vmul.f32 %v1278_v26, %v96_v25 }
 0x15b   :  { %v1480_v27 = vpop.eup %1479 }
 0x15c   :  { %v97_v28 = vmul.f32 %v1480_v27, %v81_v10  ;;  %v108_v32 = vadd.f32 %v1279_v30, %v102_v29 }
 0x15e   :  { %v103_v31 = vmul.f32 %v1278_v26, %v97_v28  ;;  %v1461_v26 = vld [vmem:[%s2029_s3 + $0x10] ss:$0 sps:$4 sm:$0xff]  }
 0x160   :  { %v109_v33 = vadd.f32 %v1279_v30, %v103_v31 }
 0x162   :  { %v113_v34 = vpack.c.bf16 %v109_v33, %v108_v32  ;;  %v580_v32 = vsel %vm131_vm1, %v1461_v26, 0  ;;  %vm1224_vm1 = vcmask 523264  }
 0x164   :  { %1363 = vmatmul.mubr.msk.bf16.vlgmr.msra.gmra.mxu0 %vm70_vm0, %v113_v34  ;;  %v516_v34 = vpop.xlane.xlu1 %515 }
 0x165   :  { %1378 = vmatprep.mubr.msk.bf16.mxu0 %vm1625_vm2, %v1624_v15  ;;  %1375 = vmatpush3.bf16.msra.mxu0 %v1465_v63  ;;  %v519_v36 = vmul.f32 0.025, %v516_v34 }
 0x166   :  { %1376 = vmatprep.subr.bf16.mxu0 %v1624_v15 }
 0x169   :  { %1377 = vmatpush3.bf16.msra.mxu0 %v1466_v0 }
 0x16a   :  { %1390 = vmatprep.subr.bf16.mxu0 %v1624_v15 }
 0x224   :  { %v169_v38 = vpop.f32.mrf.mxu0 }
 0x225   :  { %v170_v39 = vadd.f32 %v1280_v37, %v169_v38  ;;  %v521_v38 = vsub.f32 %v507_v2, %v519_v36 }
 0x226   :  { %v1364_v40 = vpop.f32.mrf.mxu0 }
 0x227   :  { %v178_v41 = vmul.f32 0.044715, %v170_v39  ;;  %v176_v57 = vmul.f32 0.5, %v170_v39  ;;  %v523_v40 = vmul.f32 %v521_v38, %v521_v38 }
 0x228   :  { %v172_v42 = vpop.f32.mrf.mxu0 }
 0x229   :  { %v180_v43 = vmul.f32 %v178_v41, %v170_v39  ;;  %v173_v44 = vadd.f32 %v1280_v37, %v172_v42  ;;  %v518_v37 = vmul.f32 0.025, %v513_v35  ;;  %v527_v42 = vsel %vm510_vm4, %v523_v40, 0.0 }
 0x22a   :  { %v1365_v45 = vpop.f32.mrf.mxu0  ;;  %528 = vadd.xlane.f32.xlu1 %v527_v42 }
 0x22b   :  { %v182_v46 = vmul.f32 %v180_v43, %v170_v39  ;;  %v179_v47 = vmul.f32 0.044715, %v173_v44  ;;  %v177_v58 = vmul.f32 0.5, %v173_v44  ;;  %v1468_v45 = vld [vmem:[#allocation7 + $0x8] ss:$24 sps:$4 sm:$0xff]  }
 0x22d   :  { %v184_v48 = vadd.f32 %v182_v46, %v170_v39  ;;  %v181_v49 = vmul.f32 %v179_v47, %v173_v44  ;;  %v520_v39 = vsub.f32 %v506_v1, %v518_v37  ;;  %v1469_v46 = vld [vmem:[%s2029_s3 + $0x8] sm:$0xff]   ;;  %v1470_v47 = vld [vmem:[%s2029_s3] sm:$0xff]  }
 0x22f   :  { %v186_v50 = vmul.f32 0.7978846, %v184_v48  ;;  %v183_v51 = vmul.f32 %v181_v49, %v173_v44  ;;  %v522_v41 = vmul.f32 %v520_v39, %v520_v39 }
 0x231   :  { %1481 = vtanh.f32 %v186_v50  ;;  %v185_v52 = vadd.f32 %v183_v51, %v173_v44  ;;  %v524_v43 = vsel %vm510_vm4, %v522_v41, 0.0  ;;  %v1467_v44 = vld [vmem:[#allocation7 + $0x38] ss:$24 sps:$4 sm:$0xff]  }
 0x232   :  { %525 = vadd.xlane.f32.xlu0 %v524_v43 }
 0x233   :  { %v187_v53 = vmul.f32 0.7978846, %v185_v52 }
 0x235   :  { %1483 = vtanh.f32 %v187_v53 }
 0x23e   :  { %v1482_v54 = vpop.eup %1481 }
 0x23f   :  { %v190_v55 = vadd.f32 1.0, %v1482_v54 }
 0x241   :  { %v1723_v60 = vmul.f32 %v190_v55, %v176_v57  ;;  %v1300_v55 = vld [vmem:[%s2031_s5 + $0x8] ss:$0 sm:$0xff] }
 0x242   :  { %v1484_v56 = vpop.eup %1483 }
 0x243   :  { %v191_v59 = vadd.f32 1.0, %v1484_v56 }
 0x245   :  { %v1725_v61 = vmul.f32 %v191_v59, %v177_v58  ;;  %v1301_v59 = vld [vmem:[%s2031_s5 + $0x9] ss:$0 sm:$0xff] }
 0x247   :  { %v198_v62 = vpack.c.bf16 %v1725_v61, %v1723_v60 }
 0x249   :  { %1371 = vmatmul.mubr.msk.bf16.vlgmr.msra.gmra.mxu1 %vm211_vm3, %v198_v62 }
 0x24a   :  { %1386 = vmatprep.mubr.msk.bf16.mxu1 %vm1625_vm2, %v1624_v15  ;;  %1383 = vmatpush3.bf16.msra.mxu1 %v1467_v44 }
 0x24b   :  { %1384 = vmatprep.subr.bf16.mxu1 %v1624_v15 }
 0x24e   :  { %1385 = vmatpush3.bf16.msra.mxu1 %v1468_v45 }
 0x24f   :  { %1400 = vmatprep.subr.bf16.mxu1 %v1624_v15 }
 0x2b3   :  { %v529_v48 = vpop.xlane.xlu1 %528 }
 0x2b4   :  { %v531_v50 = vmul.f32 0.025, %v529_v48 }
 0x2b6   :  { %v533_v52 = vadd.f32 1e-05, %v531_v50 }
 0x2bb   :  { %v526_v49 = vpop.xlane.xlu0 %525 }
 0x2bc   :  { %v530_v51 = vmul.f32 0.025, %v526_v49 }
 0x2be   :  { %v532_v53 = vadd.f32 1e-05, %v530_v51 }
 0x309   :  { %v1739_v6 = vpop.f32.mrf.mxu1 }
 0x30a   :  { %v261_v7 = vadd.f32 %v1287_v5, %v1739_v6 }
 0x30b   :  { %v1372_v8 = vpop.f32.mrf.mxu1 }
 0x30c   :  { %v265_v9 = vmul.f32 0.044715, %v261_v7  ;;  %v263_v27 = vmul.f32 0.5, %v261_v7 }
 0x30d   :  { %v1742_v10 = vpop.f32.mrf.mxu1 }
 0x30e   :  { %v267_v11 = vmul.f32 %v265_v9, %v261_v7  ;;  %v262_v12 = vadd.f32 %v1287_v5, %v1742_v10 }
 0x30f   :  { %v1373_v13 = vpop.f32.mrf.mxu1 }
 0x310   :  { %v269_v14 = vmul.f32 %v267_v11, %v261_v7  ;;  %v266_v16 = vmul.f32 0.044715, %v262_v12  ;;  %v264_v28 = vmul.f32 0.5, %v262_v12 }
 0x312   :  { %v271_v17 = vadd.f32 %v269_v14, %v261_v7  ;;  %v268_v18 = vmul.f32 %v266_v16, %v262_v12 }
 0x314   :  { %v273_v19 = vmul.f32 0.7978846, %v271_v17  ;;  %v270_v20 = vmul.f32 %v268_v18, %v262_v12 }
 0x316   :  { %1485 = vtanh.f32 %v273_v19  ;;  %v272_v21 = vadd.f32 %v270_v20, %v262_v12  ;;  %v1295_v20 = vld [vmem:[%s2031_s5 + $0x5] ss:$0 sm:$0xff] }
 0x318   :  { %v274_v22 = vmul.f32 0.7978846, %v272_v21 }
 0x31a   :  { %1487 = vtanh.f32 %v274_v22 }
 0x31b   :  { %1489 = vrsqrt.f32 %v533_v52  ;;  %v1471_v52 = vld [vmem:[#allocation7 + $0x3c] ss:$24 sps:$4 sm:$0xff]  }
 0x31c   :  { %1491 = vrsqrt.f32 %v532_v53 }
 0x323   :  { %v1486_v23 = vpop.eup %1485 }
 0x324   :  { %v277_v24 = vadd.f32 1.0, %v1486_v23  ;;  %v1296_v23 = vld [vmem:[%s2031_s5 + $0x6] ss:$0 sm:$0xff] }
 0x326   :  { %v279_v30 = vmul.f32 %v277_v24, %v263_v27 }
 0x327   :  { %v1488_v25 = vpop.eup %1487 }
 0x328   :  { %v278_v29 = vadd.f32 1.0, %v1488_v25  ;;  %v1490_v54 = vpop.eup %1489 }
 0x329   :  { %v1492_v56 = vpop.eup %1491  ;;  %v537_v57 = vmul.f32 %v1490_v54, %v521_v38  ;;  %v1628_v38 = vmov 0   ;;  %v1472_v54 = vld [vmem:[#allocation7 + $0xc] ss:$24 sps:$4 sm:$0xff]  }
 0x32a   :  { %v280_v31 = vmul.f32 %v278_v29, %v264_v28  ;;  %v536_v58 = vmul.f32 %v1492_v56, %v520_v39  ;;  %1452 = vset.pattern.permute.xlu0 %v1628_v38  ;;  %1453 = vset.pattern.permute.xlu1 %v1628_v38  ;;  %v1297_v39 = vld [vmem:[%s2031_s5 + $0x7] ss:$0 sm:$0xff]  ;;  %v1302_v56 = vld [vmem:[%s2031_s5 + $0xa] ss:$0 sm:$0xff] }
 0x32b   :  { %v543_v62 = vmul.f32 %v1300_v55, %v537_v57 }
 0x32c   :  { %v285_v33 = vpack.c.bf16 %v280_v31, %v279_v30  ;;  %v542_v63 = vmul.f32 %v1300_v55, %v536_v58 }
 0x32d   :  { %v549_v0 = vadd.f32 %v1301_v59, %v543_v62 }
 0x32e   :  { %1379 = vmatmul.mubr.msk.bf16.vlgmr.msra.gmra.mxu0 %vm211_vm3, %v285_v33  ;;  %v548_v1 = vadd.f32 %v1301_v59, %v542_v63 }
 0x32f   :  { %1391 = vmatpush3.bf16.msra.mxu0 %v580_v32  ;;  %1396 = vmatprep.mubr.msk.bf16.mxu0 %vm1625_vm2, %v1624_v15 }
 0x330   :  { %1392 = vmatprep.subr.bf16.mxu0 %v1624_v15  ;;  %v555_v2 = vpack.c.bf16 %v549_v0, %v548_v1 }
 0x333   :  { %1393 = vmatpush3.bf16.msra.mxu0 %v1469_v46 }
 0x334   :  { %1394 = vmatprep.subr.bf16.mxu0 %v1624_v15 }
 0x337   :  { %1395 = vmatpush3.bf16.msra.mxu0 %v1470_v47 }
 0x338   :  { %1416 = vmatprep.subr.bf16.mxu0 %v1624_v15 }
 0x33a   :  { %1397 = vmatmul.mubr.msk.bf16.vlgmr.msra.gmra.mxu0 %vm510_vm4, %v555_v2 }
 0x33b   :  { %1420 = vmatprep.mubr.msk.bf16.mxu0 %vm1625_vm2, %v1624_v15 }
 0x3ee   :  { %v335_v3 = vpop.f32.mrf.mxu0 }
 0x3ef   :  { %v1777_v8 = vadd.f32 %v1291_v4, %v335_v3 }
 0x3f0   :  { %v1380_v5 = vpop.f32.mrf.mxu0 }
 0x3f2   :  { %v338_v7 = vpop.f32.mrf.mxu0 }
 0x3f3   :  { %v1779_v9 = vadd.f32 %v1291_v4, %v338_v7 }
 0x3f4   :  { %v1381_v11 = vpop.f32.mrf.mxu0 }
 0x3f5   :  { %v353_v12 = vpack.c.bf16 %v1779_v9, %v1777_v8 }
 0x3f7   :  { %1387 = vmatmul.mubr.msk.bf16.vlgmr.msra.gmra.mxu1 %vm211_vm3, %v353_v12 }
 0x3f8   :  { %1404 = vmatprep.mubr.msk.bf16.mxu1 %vm1625_vm2, %v1624_v15  ;;  %1401 = vmatpush3.bf16.msra.mxu1 %v1471_v52 }
 0x3f9   :  { %1402 = vmatprep.subr.bf16.mxu1 %v1624_v15 }
 0x3fa   :  { %v1787_v16 = vpop.f32.mrf.mxu0 }
 0x3fb   :  { %v617_v57 = vadd.f32 %v1302_v56, %v1787_v16 }
 0x3fc   :  { %v1398_v18 = vpop.f32.mrf.mxu0  ;;  %1403 = vmatpush3.bf16.msra.mxu1 %v1472_v54 }
 0x3fd   :  { %1408 = vmatprep.subr.bf16.mxu1 %v1624_v15  ;;  %v625_v59 = vmul.f32 0.044715, %v617_v57 }
 0x3fe   :  { %v619_v21 = vpop.f32.mrf.mxu0 }
 0x3ff   :  { %v620_v58 = vadd.f32 %v1302_v56, %v619_v21  ;;  %v627_v63 = vmul.f32 %v625_v59, %v617_v57  ;;  %v1312_v59 = vld [vmem:[%s2031_s5 + $0xd] ss:$0 sm:$0xff] }
 0x400   :  { %v1399_v22 = vpop.f32.mrf.mxu0 }
 0x401   :  { %v626_v62 = vmul.f32 0.044715, %v620_v58  ;;  %v629_v1 = vmul.f32 %v627_v63, %v617_v57 }
 0x403   :  { %v628_v0 = vmul.f32 %v626_v62, %v620_v58  ;;  %v631_v3 = vadd.f32 %v629_v1, %v617_v57 }
 0x405   :  { %v630_v2 = vmul.f32 %v628_v0, %v620_v58  ;;  %v633_v5 = vmul.f32 0.7978846, %v631_v3  ;;  %v1321_v3 = vld [vmem:[%s2031_s5 + $0x10] ss:$0 sm:$0xff] }
 0x407   :  { %v632_v4 = vadd.f32 %v630_v2, %v620_v58 }
 0x409   :  { %v634_v7 = vmul.f32 0.7978846, %v632_v4 }
 0x4b7   :  { %v403_v13 = vpop.f32.mrf.mxu1 }
 0x4b8   :  { %412 = vrot.lane.b32.xlu0 %v403_v13, %s1626_s13 }
 0x4b9   :  { %v1388_v14 = vpop.f32.mrf.mxu1 }
 0x4bb   :  { %v406_v17 = vpop.f32.mrf.mxu1 }
 0x4bc   :  { %414 = vrot.lane.b32.xlu1 %v406_v17, %s1626_s13 }
 0x4bd   :  { %v1389_v19 = vpop.f32.mrf.mxu1 }
 0x4c0   :  { %426 = vrot.lane.b32.xlu1 %v1295_v20, %s1626_s13 }
 0x4c4   :  { %440 = vrot.lane.b32.xlu1 %v1296_v23, %s1626_s13 }
 0x52a   :  { %v413_v24 = vpop.permute.xlu0 %412 }
 0x52b   :  { %v418_v26 = vadd.f32 %v413_v24, %v1739_v6  ;;  %v623_v24 = vmul.f32 0.5, %v617_v57 }
 0x52e   :  { %v415_v25 = vpop.permute.xlu1 %414 }
 0x52f   :  { %v419_v27 = vadd.f32 %v415_v25, %v1742_v10  ;;  %v1473_v25 = vld [vmem:[#allocation7 + $0x40] ss:$24 sps:$4 sm:$0xff]  }
 0x532   :  { %v427_v28 = vpop.permute.xlu1 %426 }
 0x533   :  { %v429_v29 = vadd.f32 %v427_v28, %v418_v26  ;;  %v430_v30 = vadd.f32 %v427_v28, %v419_v27  ;;  %v624_v27 = vmul.f32 0.5, %v620_v58 }
 0x535   :  { %v431_v31 = vmax.f32 %v429_v29, 0.0  ;;  %v432_v32 = vmax.f32 %v430_v30, 0.0  ;;  %v1310_v30 = vld [vmem:[%s2031_s5 + $0xb] ss:$0 sm:$0xff] }
 0x536   :  { %v441_v33 = vpop.permute.xlu1 %440 }
 0x537   :  { %v443_v34 = vmul.f32 %v441_v33, %v431_v31  ;;  %v444_v35 = vmul.f32 %v441_v33, %v432_v32 }
 0x539   :  { %449 = vrot.lane.b32.xlu1 %v444_v35, %s1627_s18  ;;  %447 = vrot.lane.b32.xlu0 %v443_v34, %s1627_s18  ;;  %v1311_v34 = vld [vmem:[%s2031_s5 + $0xc] ss:$0 sm:$0xff] }
 0x5ab   :  { %v450_v36 = vpop.permute.xlu1 %449  ;;  %v448_v37 = vpop.permute.xlu0 %447 }
 0x5ac   :  { %v457_v6 = vsel %vm453_vm5, %v450_v36, 0.0  ;;  %v454_v10 = vsel %vm453_vm5, %v448_v37, 0.0 }
 0x5ad   :  { %458 = vadd.xlane.f32.xlu1 %v457_v6  ;;  %455 = vadd.xlane.f32.xlu0 %v454_v10 }
 0x636   :  { %v459_v40 = vpop.xlane.xlu1 %458  ;;  %v456_v41 = vpop.xlane.xlu0 %455 }
 0x637   :  { %v465_v42 = vadd.f32 %v1297_v39, %v459_v40  ;;  %v464_v43 = vadd.f32 %v1297_v39, %v456_v41  ;;  %v1319_v39 = vld [vmem:[%s2031_s5 + $0xe] ss:$0 sm:$0xff] }
 0x639   :  { %v1298_v44 = vmul.f32 -1.442695, %v464_v43  ;;  %v1299_v45 = vmul.f32 -1.442695, %v465_v42 }
 0x63b   :  { %1493 = vpow2.f32 %v1298_v44 }
 0x63c   :  { %1495 = vpow2.f32 %v1299_v45 }
 0x648   :  { %v1494_v46 = vpop.eup %1493 }
 0x649   :  { %v472_v47 = vadd.f32 1.0, %v1494_v46  ;;  %v1496_v48 = vpop.eup %1495  ;;  %v1320_v46 = vld [vmem:[%s2031_s5 + $0xf] ss:$0 sm:$0xff] }
 0x64a   :  { %v473_v49 = vadd.f32 1.0, %v1496_v48 }
 0x64b   :  { %1497 = vrcp.f32 %v472_v47 }
 0x64c   :  { %1499 = vrcp.f32 %v473_v49 }
 0x64d   :  { %1501 = vtanh.f32 %v633_v5 }
 0x64e   :  { %1503 = vtanh.f32 %v634_v7 }
 0x658   :  { %v1809_v50 = vpop.eup %1497 }
 0x659   :  { %480 = vperm.xlu0 %1452, %v1809_v50   ;;  %v490_v51 = vsub.f32 1.0, %v1809_v50  ;;  %v1813_v53 = vpop.eup %1499 }
 0x65a   :  { %v491_v55 = vsub.f32 1.0, %v1813_v53  ;;  %v1502_v16 = vpop.eup %1501 }
 0x65b   :  { %494 = vperm.xlu1 %1453, %v490_v51   ;;  %v1504_v21 = vpop.eup %1503  ;;  %v637_v26 = vadd.f32 1.0, %v1502_v16 }
 0x65c   :  { %v638_v28 = vadd.f32 1.0, %v1504_v21 }
 0x65f   :  { %485 = vperm.xlu1 %1453, %v1813_v53  }
 0x663   :  { %499 = vperm.xlu1 %1453, %v491_v55  }
 0x6d4   :  { %v481_v13 = vpop.permute.xlu0 %480 }
 0x6d5   :  { %v488_v18 = vmul.f32 %v481_v13, %v1777_v8  ;;  %v1474_v8 = vld [vmem:[#allocation7 + $0x10] ss:$24 sps:$4 sm:$0xff]  }
 0x6d6   :  { %v495_v11 = vpop.permute.xlu1 %494 }
 0x6d7   :  { %v502_v14 = vmul.f32 %v495_v11, %v1723_v60 }
 0x6d9   :  { %v1827_v22 = vadd.f32 %v502_v14, %v488_v18 }
 0x6da   :  { %v486_v12 = vpop.permute.xlu1 %485 }
 0x6db   :  { %v489_v19 = vmul.f32 %v486_v12, %v1779_v9  ;;  %v1838_v9 = vmul.f32 %v638_v28, %v624_v27 }
 0x6de   :  { %v500_v17 = vpop.permute.xlu1 %499 }
 0x6df   :  { %v503_v20 = vmul.f32 %v500_v17, %v1725_v61  ;;  %v1836_v61 = vmul.f32 %v637_v26, %v623_v24 }
 0x6e1   :  { %v1829_v23 = vadd.f32 %v503_v20, %v489_v19  ;;  %v758_v29 = vpack.c.bf16 %v1838_v9, %v1836_v61 }
 0x6e3   :  { %v645_v60 = vpack.c.bf16 %v1829_v23, %v1827_v22 }
 0x6e5   :  { %1405 = vmatmul.mubr.msk.bf16.vlgmr.msra.gmra.mxu1 %vm211_vm3, %v645_v60 }
 0x6e6   :  { %1409 = vmatpush3.bf16.msra.mxu1 %v1473_v25  ;;  %1412 = vmatprep.mubr.msk.bf16.mxu1 %vm1625_vm2, %v1624_v15  ;;  %vm1227_vm2 = vcmask 785408  }
 0x6e7   :  { %1410 = vmatprep.subr.bf16.mxu1 %v1624_v15 }
 0x6ea   :  { %1411 = vmatpush3.bf16.msra.mxu1 %v1474_v8  ;;  %v1326_v8 = vld [vmem:[%s2031_s5 + $0x14] ss:$0 sm:$0xff] }
 0x6ed   :  { %1413 = vmatmul.mubr.msk.bf16.vlgmr.msra.gmra.mxu1 %vm211_vm3, %v758_v29 }
 0x7a5   :  { %v1847_v31 = vpop.f32.mrf.mxu1 }
 0x7a6   :  { %v707_v32 = vadd.f32 %v1310_v30, %v1847_v31 }
 0x7a7   :  { %v1406_v33 = vpop.f32.mrf.mxu1 }
 0x7a8   :  { %v709_v35 = vmax.f32 %v707_v32, 0.0 }
 0x7a9   :  { %v1853_v36 = vpop.f32.mrf.mxu1 }
 0x7aa   :  { %v717_v37 = vmul.f32 %v1311_v34, %v709_v35  ;;  %v708_v6 = vadd.f32 %v1310_v30, %v1853_v36 }
 0x7ab   :  { %v1407_v10 = vpop.f32.mrf.mxu1 }
 0x7ac   :  { %v719_v40 = vsel %vm453_vm5, %v717_v37, 0.0  ;;  %v710_v41 = vmax.f32 %v708_v6, 0.0  ;;  %v1475_v6 = vld [vmem:[#allocation7 + $0x44] ss:$24 sps:$4 sm:$0xff]  }
 0x7ad   :  { %720 = vadd.xlane.f32.xlu1 %v719_v40  ;;  %v1860_v42 = vpop.f32.mrf.mxu1  ;;  %1417 = vmatpush3.bf16.msra.mxu0 %v1475_v6  ;;  %v1476_v40 = vld [vmem:[#allocation7 + $0x14] ss:$24 sps:$4 sm:$0xff]  }
 0x7ae   :  { %v718_v43 = vmul.f32 %v1311_v34, %v710_v41  ;;  %v820_v44 = vadd.f32 %v1319_v39, %v1860_v42  ;;  %v1327_v34 = vld [vmem:[%s2031_s5 + $0x15] ss:$0 sm:$0xff]  ;;  %1418 = vmatprep.subr.bf16.mxu0 %v1624_v15 }
 0x7af   :  { %v1414_v45 = vpop.f32.mrf.mxu1 }
 0x7b0   :  { %v722_v47 = vsel %vm453_vm5, %v718_v43, 0.0  ;;  %v822_v48 = vmax.f32 %v820_v44, 0.0  ;;  %v908_v44 = vadd.f32 %v1860_v42, %v1847_v31 }
 0x7b1   :  { %723 = vadd.xlane.f32.xlu0 %v722_v47  ;;  %v1867_v49 = vpop.f32.mrf.mxu1  ;;  %1419 = vmatpush3.bf16.msra.mxu0 %v1476_v40  ;;  %v1325_v40 = vld [vmem:[%s2031_s5 + $0x13] ss:$0 sm:$0xff] }
 0x7b2   :  { %v830_v51 = vmul.f32 %v1320_v46, %v822_v48  ;;  %v821_v52 = vadd.f32 %v1319_v39, %v1867_v49  ;;  %v1328_v39 = vld [vmem:[%s2031_s5 + $0x16] ss:$0 sm:$0xff]  ;;  %v909_v48 = vadd.f32 %v1867_v49, %v1853_v36 }
 0x7b3   :  { %v1415_v54 = vpop.f32.mrf.mxu1 }
 0x7b4   :  { %v832_v55 = vsel %vm453_vm5, %v830_v51, 0.0  ;;  %v823_v56 = vmax.f32 %v821_v52, 0.0 }
 0x7b5   :  { %833 = vadd.xlane.f32.xlu1 %v832_v55 }
 0x7b6   :  { %v831_v57 = vmul.f32 %v1320_v46, %v823_v56 }
 0x7b8   :  { %v835_v58 = vsel %vm453_vm5, %v831_v57, 0.0  ;;  %vm1250_vm5 = vcmask 244736  }
 0x7b9   :  { %836 = vadd.xlane.f32.xlu1 %v835_v58 }
 0x836   :  { %v721_v62 = vpop.xlane.xlu1 %720 }
 0x837   :  { %v729_v63 = vadd.f32 %v1312_v59, %v721_v62 }
 0x839   :  { %v1313_v0 = vmul.f32 -1.442695, %v729_v63 }
 0x83a   :  { %v724_v1 = vpop.xlane.xlu0 %723 }
 0x83b   :  { %1505 = vpow2.f32 %v1313_v0  ;;  %v730_v2 = vadd.f32 %v1312_v59, %v724_v1  ;;  %v1332_v0 = vld [vmem:[%s2031_s5 + $0x17] ss:$0 sm:$0xff] }
 0x83d   :  { %v1314_v4 = vmul.f32 -1.442695, %v730_v2 }
 0x83e   :  { %v834_v5 = vpop.xlane.xlu1 %833 }
 0x83f   :  { %1507 = vpow2.f32 %v1314_v4  ;;  %v842_v7 = vadd.f32 %v1321_v3, %v834_v5 }
 0x841   :  { %v1322_v11 = vmul.f32 -1.442695, %v842_v7 }
 0x842   :  { %v837_v12 = vpop.xlane.xlu1 %836 }
 0x843   :  { %1509 = vpow2.f32 %v1322_v11  ;;  %v843_v13 = vadd.f32 %v1321_v3, %v837_v12 }
 0x845   :  { %v1323_v14 = vmul.f32 -1.442695, %v843_v13 }
 0x847   :  { %1511 = vpow2.f32 %v1323_v14 }
 0x848   :  { %v1506_v17 = vpop.eup %1505 }
 0x849   :  { %v737_v16 = vadd.f32 1.0, %v1506_v17 }
 0x84b   :  { %1513 = vrcp.f32 %v737_v16 }
 0x84c   :  { %v1508_v18 = vpop.eup %1507 }
 0x84d   :  { %v738_v19 = vadd.f32 1.0, %v1508_v18 }
 0x84f   :  { %1515 = vrcp.f32 %v738_v19 }
 0x850   :  { %v1510_v20 = vpop.eup %1509 }
 0x851   :  { %v850_v21 = vadd.f32 1.0, %v1510_v20 }
 0x853   :  { %1517 = vrcp.f32 %v850_v21 }
 0x854   :  { %v1512_v24 = vpop.eup %1511 }
 0x855   :  { %v851_v25 = vadd.f32 1.0, %v1512_v24 }
 0x857   :  { %1519 = vrcp.f32 %v851_v25 }
 0x858   :  { %v1878_v26 = vpop.eup %1513 }
 0x859   :  { %869 = vperm.xlu0 %1452, %v1878_v26  }
 0x85c   :  { %v1881_v27 = vpop.eup %1515 }
 0x85d   :  { %874 = vperm.xlu1 %1453, %v1881_v27  }
 0x860   :  { %v1884_v28 = vpop.eup %1517 }
 0x861   :  { %881 = vperm.xlu1 %1453, %v1884_v28  }
 0x864   :  { %v1887_v60 = vpop.eup %1519 }
 0x865   :  { %886 = vperm.xlu0 %1452, %v1887_v60  }
 0x8d4   :  { %v1893_v29 = vpop.permute.xlu0 %869 }
 0x8d5   :  { %v915_v30 = vmul.f32 %v1326_v8, %v1893_v29 }
 0x8d7   :  { %919 = vrot.lane.b32.xlu1 %v915_v30, %s1629_s11 }
 0x8d8   :  { %v1897_v32 = vpop.permute.xlu1 %874 }
 0x8d9   :  { %v916_v33 = vmul.f32 %v1326_v8, %v1897_v32  ;;  %v1631_v8 = vmov 2  }
 0x8da   :  { %1454 = vset.pattern.permute.xlu0 %v1631_v8  ;;  %1455 = vset.pattern.permute.xlu1 %v1631_v8 }
 0x8db   :  { %921 = vrot.lane.b32.xlu0 %v916_v33, %s1629_s11 }
 0x8dc   :  { %v1904_v35 = vpop.permute.xlu1 %881 }
 0x8dd   :  { %v932_v37 = vmul.f32 %v1327_v34, %v1904_v35 }
 0x8df   :  { %936 = vrot.lane.b32.xlu1 %v932_v37, %s1629_s11 }
 0x8e0   :  { %v1908_v10 = vpop.permute.xlu0 %886 }
 0x8e1   :  { %v933_v41 = vmul.f32 %v1327_v34, %v1908_v10 }
 0x8e3   :  { %938 = vrot.lane.b32.xlu0 %v933_v41, %s1629_s11  ;;  %950 = vrot.lane.b32.xlu1 %v1328_v39, %s1629_s11  ;;  %v1633_v41 = vmov 1  }
 0x949   :  { %v920_v43 = vpop.permute.xlu1 %919 }
 0x94a   :  { %v925_v47 = vadd.f32 %v920_v43, %v908_v44  ;;  %v1315_v43 = vld [vmem:[%s2031_s5 + $0x11] ss:$0 sm:$0xff]  ;;  %v1324_v44 = vld [vmem:[%s2031_s5 + $0x12] ss:$0 sm:$0xff]  ;;  %s1635_s5 = smov 122  }
 0x94d   :  { %v922_v45 = vpop.permute.xlu0 %921 }
 0x94e   :  { %v926_v51 = vadd.f32 %v922_v45, %v909_v48  ;;  %v893_v45 = vmul.f32 %v1904_v35, %v1860_v42  ;;  %v892_v48 = vmul.f32 %v1897_v32, %v1853_v36 }
 0x951   :  { %v937_v46 = vpop.permute.xlu1 %936 }
 0x952   :  { %v942_v52 = vadd.f32 %v937_v46, %v925_v47  ;;  %v894_v46 = vmul.f32 %v1908_v10, %v1867_v49 }
 0x955   :  { %v939_v54 = vpop.permute.xlu0 %938  ;;  %v951_v55 = vpop.permute.xlu1 %950 }
 0x956   :  { %v943_v15 = vadd.f32 %v939_v54, %v926_v51  ;;  %v953_v56 = vadd.f32 %v951_v55, %v942_v52  ;;  %v896_v52 = vadd.f32 %v894_v46, %v892_v48 }
 0x958   :  { %v954_v57 = vadd.f32 %v951_v55, %v943_v15  ;;  %v955_v58 = vmax.f32 %v953_v56, 0.0 }
 0x95a   :  { %v956_v59 = vmax.f32 %v954_v57, 0.0 }
 0x95c   :  { %v961_v62 = vpack.c.bf16 %v956_v59, %v955_v58 }
 0x95e   :  { %963 = vrot.lane.b32.xlu0 %v961_v62, %s1630_s1 }
 0x9d0   :  { %v964_v63 = vpop.permute.xlu0 %963 }
 0x9d1   :  { %1421 = vmatmul.mubr.msk.bf16.vlgmr.msra.gmra.mxu0 %vm211_vm3, %v964_v63 }
 0xa91   :  { %v1014_v1 = vpop.f32.mrf.mxu0 }
 0xa92   :  { %v1026_v2 = vadd.f32 %v1332_v0, %v1014_v1 }
 0xa93   :  { %v1422_v3 = vpop.f32.mrf.mxu0 }
 0xa94   :  { %v1029_v4 = vsel %vm1028_vm6, %v1026_v2, -inf }
 0xa95   :  { %1030 = vmax.xlane.f32.xlu1 %v1029_v4  ;;  %v1017_v5 = vpop.f32.mrf.mxu0 }
 0xa96   :  { %v1027_v7 = vadd.f32 %v1332_v0, %v1017_v5 }
 0xa97   :  { %v1423_v11 = vpop.f32.mrf.mxu0 }
 0xa98   :  { %v1032_v12 = vsel %vm1028_vm6, %v1027_v7, -inf }
 0xa99   :  { %1033 = vmax.xlane.f32.xlu0 %v1032_v12 }
 0xb1e   :  { %v1031_v13 = vpop.xlane.xlu1 %1030 }
 0xb1f   :  { %v1035_v14 = vsub.f32 %v1026_v2, %v1031_v13 }
 0xb21   :  { %v1037_v17 = vmul.f32 1.442695, %v1035_v14 }
 0xb22   :  { %v1034_v16 = vpop.xlane.xlu0 %1033 }
 0xb23   :  { %1521 = vpow2.f32 %v1037_v17  ;;  %v1036_v18 = vsub.f32 %v1027_v7, %v1034_v16 }
 0xb25   :  { %v1039_v19 = vmul.f32 1.442695, %v1036_v18 }
 0xb27   :  { %1523 = vpow2.f32 %v1039_v19 }
 0xb30   :  { %v1522_v20 = vpop.eup %1521 }
 0xb31   :  { %v1041_v21 = vsel %vm1028_vm6, %v1522_v20, 0.0 }
 0xb32   :  { %1042 = vadd.xlane.f32.xlu0 %v1041_v21 }
 0xb34   :  { %v1524_v24 = vpop.eup %1523 }
 0xb35   :  { %v1044_v25 = vsel %vm1028_vm6, %v1524_v24, 0.0  ;;  %vm1253_vm6 = vcmask 252928  }
 0xb36   :  { %1045 = vadd.xlane.f32.xlu1 %v1044_v25 }
 0xbbb   :  { %v1043_v30 = vpop.xlane.xlu0 %1042 }
 0xbbc   :  { %1525 = vrcp.f32 %v1043_v30 }
 0xbbf   :  { %v1046_v33 = vpop.xlane.xlu1 %1045 }
 0xbc0   :  { %1527 = vrcp.f32 %v1046_v33 }
 0xbc9   :  { %v1526_v34 = vpop.eup %1525 }
 0xbca   :  { %v1929_v37 = vmul.f32 %v1526_v34, %v1522_v20 }
 0xbcc   :  { %1076 = vperm.xlu0 %1454, %v1929_v37  }
 0xbcd   :  { %v1528_v6 = vpop.eup %1527 }
 0xbce   :  { %v1932_v39 = vmul.f32 %v1528_v6, %v1524_v24 }
 0xbd0   :  { %1080 = vperm.xlu1 %1455, %v1932_v39  }
 0xbd4   :  { %903 = vrot.lane.b32.xlu1 %v1325_v40, %s1632_s20 }
 0xbd5   :  { %1456 = vset.pattern.permute.xlu1 %v1628_v38 }
 0xbd8   :  { %1053 = vperm.xlu1 %1456, %v1929_v37  }
 0xbdc   :  { %1457 = vset.pattern.permute.xlu1 %v1633_v41 }
 0xbdd   :  { %1064 = vperm.xlu1 %1457, %v1929_v37  }
 0xbe1   :  { %749 = vrot.lane.b32.xlu1 %v1315_v43, %s1634_s23 }
 0xbe2   :  { %1458 = vset.pattern.permute.xlu1 %v1628_v38  ;;  %v891_v38 = vmul.f32 %v1893_v29, %v1847_v31 }
 0xbe4   :  { %v895_v51 = vadd.f32 %v893_v45, %v891_v38 }
 0xbe5   :  { %1058 = vperm.xlu1 %1458, %v1932_v39  }
 0xbe9   :  { %1459 = vset.pattern.permute.xlu1 %v1633_v41 }
 0xbea   :  { %1068 = vperm.xlu1 %1459, %v1932_v39  }
 0xbee   :  { %862 = vrot.lane.b32.xlu1 %v1324_v44, %s1634_s23 }
 0xc47   :  { %v1077_v56 = vpop.permute.xlu0 %1076 }
 0xc4b   :  { %v1081_v47 = vpop.permute.xlu1 %1080 }
 0xc4f   :  { %v904_v54 = vpop.permute.xlu1 %903 }
 0xc50   :  { %v906_v55 = vadd.f32 %v904_v54, %v895_v51  ;;  %v907_v15 = vadd.f32 %v904_v54, %v896_v52 }
 0xc52   :  { %v1083_v57 = vmul.f32 %v1077_v56, %v906_v55  ;;  %v1084_v58 = vmul.f32 %v1081_v47, %v907_v15 }
 0xc53   :  { %v1054_v59 = vpop.permute.xlu1 %1053 }
 0xc54   :  { %1089 = vrot.lane.b32.xlu1 %v1084_v58, %s1635_s5  ;;  %1087 = vrot.lane.b32.xlu0 %v1083_v57, %s1635_s5 }
 0xc58   :  { %v1065_v62 = vpop.permute.xlu1 %1064 }
 0xc5c   :  { %v750_v63 = vpop.permute.xlu1 %749 }
 0xc5d   :  { %v752_v5 = vadd.f32 %v750_v63, %v1847_v31  ;;  %v753_v7 = vadd.f32 %v750_v63, %v1853_v36  ;;  %v1102_v31 = vlaneseq }
 0xc5f   :  { %v1061_v13 = vmul.f32 %v1054_v59, %v752_v5  ;;  %v1103_v36 = vand.u32 127, %v1102_v31 }
 0xc60   :  { %v1059_v0 = vpop.permute.xlu1 %1058 }
 0xc61   :  { %v1062_v14 = vmul.f32 %v1059_v0, %v753_v7 }
 0xc65   :  { %v1069_v1 = vpop.permute.xlu1 %1068 }
 0xc69   :  { %v863_v2 = vpop.permute.xlu1 %862 }
 0xc6a   :  { %v865_v3 = vadd.f32 %v863_v2, %v1860_v42  ;;  %v866_v4 = vadd.f32 %v863_v2, %v1867_v49 }
 0xc6c   :  { %v1071_v11 = vmul.f32 %v1065_v62, %v865_v3  ;;  %v1072_v12 = vmul.f32 %v1069_v1, %v866_v4 }
 0xc6e   :  { %v1074_v17 = vadd.f32 %v1072_v12, %v1062_v14  ;;  %v1073_v16 = vadd.f32 %v1071_v11, %v1061_v13  ;;  %v877_v13 = vmul.f32 %v1893_v29, %v1827_v22 }
 0xcc6   :  { %v1090_v18 = vpop.permute.xlu1 %1089  ;;  %v1088_v19 = vpop.permute.xlu0 %1087 }
 0xcc7   :  { %v1964_v20 = vadd.f32 %v1090_v18, %v1074_v17  ;;  %v1093_v21 = vadd.f32 %v1088_v19, %v1073_v16 }
 0xcc9   :  { %1170 = vrot.lane.b32.xlu1 %v1964_v20, %s1636_s27  ;;  %v1096_v42 = vsel %vm1095_vm7, %v1093_v21, -inf  ;;  %v1099_v49 = vsel %vm1095_vm7, %v1964_v20, -inf }
 0xcca   :  { %1097 = vmax.xlane.f32.xlu0 %v1096_v42 }
 0xce0   :  { %1106 = vrot.lane.b32.xlu0 %v1103_v36, %s1634_s23  ;;  %v889_v36 = vmul.f32 %v1904_v35, %v1836_v61 }
 0xce4   :  { %1168 = vrot.lane.b32.xlu0 %v1093_v21, %s1636_s27 }
 0xce8   :  { %1176 = vrot.lane.b32.xlu0 %v752_v5, %s1637_s28 }
 0xcec   :  { %1178 = vrot.lane.b32.xlu0 %v753_v7, %s1637_s28 }
 0xced   :  { %1100 = vmax.xlane.f32.xlu1 %v1099_v49 }
 0xcf0   :  { %1184 = vrot.lane.b32.xlu0 %v865_v3, %s1638_s29 }
 0xcf4   :  { %1186 = vrot.lane.b32.xlu0 %v866_v4, %s1638_s29 }
 0xcf8   :  { %1194 = vrot.lane.b32.xlu0 %v907_v15, %s1638_s29 }
 0xcfc   :  { %1200 = vrot.lane.b32.xlu0 %v1932_v39, %s1623_s14 }
 0xcfe   :  { %1192 = vrot.lane.b32.xlu1 %v906_v55, %s1638_s29 }
 0xd00   :  { %1206 = vrot.lane.b32.xlu0 %v1881_v27, %s1639_s30  ;;  %v878_v27 = vmul.f32 %v1897_v32, %v1829_v23 }
 0xd02   :  { %1198 = vrot.lane.b32.xlu1 %v1929_v37, %s1623_s14 }
 0xd04   :  { %1212 = vrot.lane.b32.xlu0 %v1887_v60, %s1629_s11 }
 0xd06   :  { %1204 = vrot.lane.b32.xlu1 %v1878_v26, %s1639_s30  ;;  %v890_v26 = vmul.f32 %v1908_v10, %v1838_v9 }
 0xd08   :  { %1146 = vrot.lane.b32.xlu0 %v1838_v9, %s1626_s13 }
 0xd0a   :  { %1210 = vrot.lane.b32.xlu1 %v1884_v28, %s1629_s11 }
 0xd0c   :  { %1218 = vrot.lane.b32.xlu0 %v1813_v53, %s1640_s7 }
 0xd0e   :  { %1144 = vrot.lane.b32.xlu1 %v1836_v61, %s1626_s13 }
 0xd10   :  { %1154 = vrot.lane.b32.xlu0 %v878_v27, %s1616_s24 }
 0xd12   :  { %1216 = vrot.lane.b32.xlu1 %v1809_v50, %s1640_s7 }
 0xd14   :  { %1162 = vrot.lane.b32.xlu0 %v890_v26, %s1627_s18 }
 0xd3b   :  { %v1171_v34 = vpop.permute.xlu1 %1170 }
 0xd53   :  { %v1098_v60 = vpop.xlane.xlu0 %1097 }
 0xd54   :  { %vm1104_vm8 = vcmp.eq.f32.partialorder %v1093_v21, %v1098_v60 }
 0xd57   :  { %v1107_v28 = vpop.permute.xlu0 %1106 }
 0xd58   :  { %v1108_v24 = vsel %vm1104_vm8, %v1107_v28, 6 }
 0xd59   :  { %v1110_v53 = vsel %vm1095_vm7, %v1108_v24, 2147483647 }
 0xd5a   :  { %v1112_v25 = vshra.s32 %v1110_v53, 16  ;;  %v1111_v16 = vand.u32 65535, %v1110_v53 }
 0xd5b   :  { %v1169_v8 = vpop.permute.xlu0 %1168 }
 0xd5c   :  { %v1114_v30 = vcvt.s32.f32 %v1112_v25  ;;  %v1113_v19 = vcvt.s32.f32 %v1111_v16 }
 0xd5e   :  { %1115 = vmin.xlane.f32.xlu1 %v1114_v30 }
 0xd5f   :  { %v1177_v32 = vpop.permute.xlu0 %1176 }
 0xd60   :  { %v1231_v33 = vsel %vm1230_vm9, %v1169_v8, %v1177_v32 }
 0xd63   :  { %v1179_v37 = vpop.permute.xlu0 %1178 }
 0xd64   :  { %v1232_v9 = vsel %vm1230_vm9, %v1171_v34, %v1179_v37 }
 0xd67   :  { %v1185_v50 = vpop.permute.xlu0 %1184 }
 0xd68   :  { %v1234_v10 = vsel %vm1233_vm10, %v1231_v33, %v1185_v50 }
 0xd6b   :  { %v1187_v6 = vpop.permute.xlu0 %1186 }
 0xd6c   :  { %v1235_v39 = vsel %vm1233_vm10, %v1232_v9, %v1187_v6 }
 0xd6f   :  { %v1195_v40 = vpop.permute.xlu0 %1194 }
 0xd70   :  { %v1238_v41 = vsel %vm1236_vm11, %v1235_v39, %v1195_v40 }
 0xd73   :  { %v1201_v43 = vpop.permute.xlu0 %1200 }
 0xd74   :  { %v1240_v44 = vsel %vm70_vm0, %v1238_v41, %v1201_v43 }
 0xd76   :  { %v1101_v45 = vpop.xlane.xlu1 %1100 }
 0xd77   :  { %vm1105_vm13 = vcmp.eq.f32.partialorder %v1964_v20, %v1101_v45  ;;  %v1207_v46 = vpop.permute.xlu0 %1206 }
 0xd78   :  { %v1109_v47 = vsel %vm1105_vm13, %v1107_v28, 6  ;;  %v1243_v38 = vsel %vm1241_vm12, %v1240_v44, %v1207_v46 }
 0xd79   :  { %v1125_v48 = vsel %vm1095_vm7, %v1109_v47, 2147483647 }
 0xd7a   :  { %v1193_v51 = vpop.permute.xlu1 %1192  ;;  %v1127_v52 = vshra.s32 %v1125_v48, 16 }
 0xd7b   :  { %v1237_v54 = vsel %vm1236_vm11, %v1234_v10, %v1193_v51  ;;  %v1213_v55 = vpop.permute.xlu0 %1212 }
 0xd7c   :  { %v1246_v15 = vsel %vm1244_vm14, %v1243_v38, %v1213_v55  ;;  %v1129_v56 = vcvt.s32.f32 %v1127_v52 }
 0xd7e   :  { %v1199_v57 = vpop.permute.xlu1 %1198  ;;  %1130 = vmin.xlane.f32.xlu1 %v1129_v56 }
 0xd7f   :  { %v1239_v58 = vsel %vm70_vm0, %v1237_v54, %v1199_v57  ;;  %v1147_v59 = vpop.permute.xlu0 %1146 }
 0xd80   :  { %v1223_v5 = vsel %vm211_vm3, %v1829_v23, %v1147_v59  ;;  %v1126_v23 = vand.u32 65535, %v1125_v48 }
 0xd82   :  { %v1205_v62 = vpop.permute.xlu1 %1204  ;;  %v1128_v42 = vcvt.s32.f32 %v1126_v23 }
 0xd83   :  { %v1242_v63 = vsel %vm1241_vm12, %v1239_v58, %v1205_v62  ;;  %v1219_v0 = vpop.permute.xlu0 %1218 }
 0xd84   :  { %v1249_v1 = vsel %vm1247_vm15, %v1246_v15, %v1219_v0 }
 0xd86   :  { %v1211_v2 = vpop.permute.xlu1 %1210 }
 0xd87   :  { %v1245_v3 = vsel %vm1244_vm14, %v1242_v63, %v1211_v2  ;;  %v1155_v4 = vpop.permute.xlu0 %1154 }
 0xd88   :  { %v1226_v7 = vsel %vm1224_vm1, %v1223_v5, %v1155_v4 }
 0xd8a   :  { %v1145_v14 = vpop.permute.xlu1 %1144 }
 0xd8b   :  { %v1163_v11 = vpop.permute.xlu0 %1162  ;;  %v1222_v33 = vsel %vm211_vm3, %v1827_v22, %v1145_v14 }
 0xd8c   :  { %v1229_v12 = vsel %vm1227_vm2, %v1226_v7, %v1163_v11 }
 0xd8d   :  { %1258 = vst [vmem:[#allocation8 + $0x10] sm:$0xff] %v1229_v12 }
 0xd8e   :  { %v1217_v17 = vpop.permute.xlu1 %1216 }
 0xd8f   :  { %1152 = vrot.lane.b32.xlu1 %v877_v13, %s1616_s24  ;;  %v1248_v53 = vsel %vm1247_vm15, %v1245_v3, %v1217_v17  ;;  %s1641_s24 = smov [#allocation8]  }
 0xd90   :  { %s1265_s14 = sshll.u32 %s1641_s24, 4  ;;  %s1266_s14 = int_to_ptr.vmem [resolvable:$true] %s1265_s14 }
 0xd91   :  { %s1589_s13 = scalar_lea.vmem %s1266_s14, 512  ;;  %p1594_p2 = scmp.lt.s32.totalorder %s1266_s14, %s1266_s14 }
 0xd92   :  { %p1590_p1 = scmp.ne.s32.totalorder %s1266_s14, %s1589_s13  ;;  %p1595_p3 = scmp.lt.s32.totalorder %s1589_s13, %s1589_s13 }
 0xd94   :  { %p1596_p4 = por %p1595_p3, %p1594_p2 }
 0xd96   :  { %p1597_p5 = pnand %p1596_p4, %p1590_p1 }
 0xde7   :  { %v1116_v18 = vpop.xlane.xlu1 %1115 }
 0xde8   :  { %vm1117_vm0 = vcmp.eq.f32.partialorder %v1114_v30, %v1116_v18  ;;  %v1122_v49 = vcvt.f32.s32 %v1116_v18 }
 0xde9   :  { %v1118_v20 = vsel %vm1117_vm0, %v1113_v19, inf }
 0xdea   :  { %1119 = vmin.xlane.f32.xlu1 %v1118_v20  ;;  %v1123_v26 = vshll.u32 %v1122_v49, 16 }
 0xe07   :  { %v1131_v21 = vpop.xlane.xlu1 %1130 }
 0xe08   :  { %vm1132_vm4 = vcmp.eq.f32.partialorder %v1129_v56, %v1131_v21  ;;  %v1137_v30 = vcvt.f32.s32 %v1131_v21 }
 0xe09   :  { %v1133_v31 = vsel %vm1132_vm4, %v1128_v42, inf }
 0xe0a   :  { %1134 = vmin.xlane.f32.xlu1 %v1133_v31  ;;  %v1138_v35 = vshll.u32 %v1137_v30, 16 }
 0xe0b   :  { %v1153_v29 = vpop.permute.xlu1 %1152 }
 0xe0c   :  { %v1225_v37 = vsel %vm1224_vm1, %v1222_v33, %v1153_v29 }
 0xe1b   :  { %1160 = vrot.lane.b32.xlu1 %v889_v36, %s1627_s18 }
 0xe73   :  { %v1120_v27 = vpop.xlane.xlu1 %1119 }
 0xe74   :  { %v1121_v60 = vcvt.f32.s32 %v1120_v27 }
 0xe76   :  { %v1124_v28 = vadd.s32 %v1123_v26, %v1121_v60 }
 0xe78   :  { %v1140_v24 = vcvt.s32.f32 %v1124_v28 }
 0xe7a   :  { %v1251_v25 = vsel %vm1250_vm5, %v1248_v53, %v1140_v24 }
 0xe7b   :  { %v1254_v8 = vsel %vm1253_vm6, %v1251_v25, 0.0 }
 0xe7c   :  { %1257 = vst [vmem:[#allocation8 + $0x8] sm:$0xff] %v1254_v8 }
 0xe93   :  { %v1135_v61 = vpop.xlane.xlu1 %1134 }
 0xe94   :  { %v1136_v32 = vcvt.f32.s32 %v1135_v61 }
 0xe96   :  { %v1139_v34 = vadd.s32 %v1138_v35, %v1136_v32 }
 0xe97   :  { %v1161_v9 = vpop.permute.xlu1 %1160 }
 0xe98   :  { %v1141_v50 = vcvt.s32.f32 %v1139_v34  ;;  %v1228_v10 = vsel %vm1227_vm2, %v1225_v37, %v1161_v9 }
 0xe99   :  { %1256 = vst [vmem:[#allocation8] sm:$0xff] %v1228_v10 }
 0xe9a   :  { %v1252_v6 = vsel %vm1250_vm5, %v1249_v1, %v1141_v50 }
 0xe9b   :  { %v1255_v39 = vsel %vm1253_vm6, %v1252_v6, 0.0 }
 0xe9c   :  { %1259 = vst [vmem:[#allocation8 + $0x18] sm:$0xff] %v1255_v39 }
 0xe9d   :  { %1600 = shalt.err (!%p1597_p5)
}
 0xe9e   :  { %s1642_s18 = smov 256  }
 0xe9f   :  { %1271 = dma.vmem_to_hbm [thread:$0]  %s1266_s14, 512, %s2032_s6, [#allocation4], %s1642_s18, %s1642_s18, %s1634_s23  }
 0xea0   :  { %1613 = dma.done.wait [#allocation4], 512  }
 0xea1   :  { %1614 = vsyncadd [#allocation4], 4294966784 }
 0xea2   :  { %1275 = vsyncpa [#allocation3], 1 }
 0xea3   :  { %1276 = vsyncpa [#allocation6], 1 }
 0xea4   :  { %1277 = vsyncpa [#allocation4], 1 }

</bundles_post_ra>
